<compile_context>
chip_gen: v7x
topology: tpu7x:2x2x1
jax: 0.10.0
libtpu: 0.0.40
codegen_flags: <defaults>
</compile_context>

<pallas_src>
import functools
import math

import numpy as np
import jax
import jax.numpy as jnp
from jax.experimental import pallas as pl
from jax.experimental.pallas import tpu as pltpu


_VMEM = pl.BlockSpec(memory_space=pltpu.MemorySpace.VMEM)
_SMEM = pl.BlockSpec(memory_space=pltpu.MemorySpace.SMEM)


def _layer_norm(v, g, b, eps=1e-5):
    mu = jnp.mean(v, axis=-1, keepdims=True)
    var = jnp.mean((v - mu) ** 2, axis=-1, keepdims=True)
    return (v - mu) * jax.lax.rsqrt(var + eps) * g + b


# ------------------------- fully fused forward kernel -------------------------

def _maitts_forward_kernel(*refs, B, T, H, d_k, n_mixer, n_enc):
    f32 = jnp.float32
    it = iter(refs)
    # ---- inputs ----
    x_ref, m_ref, xi_ref, im_ref = (next(it) for _ in range(4))
    mixers = [tuple(next(it) for _ in range(4)) for _ in range(n_mixer)]
    emb_w1_ref, emb_w2_ref, emb_b_ref, pos_ref = (next(it) for _ in range(4))
    encs = [tuple(next(it) for _ in range(12)) for _ in range(n_enc)]
    bw_ref, bb_ref, gw_ref, gb_ref = (next(it) for _ in range(4))
    wcm_ref, wca_ref, wcb_ref = (next(it) for _ in range(3))
    # ---- outputs ----
    out_ref = next(it)      # [B*T, F]  imputed data (X_c)
    sums_ref = next(it)     # SMEM (6,) masked-MAE sums + mask counts
    # ---- scratch ----
    s_mf = next(it)         # VMEM [B*T, F]
    s_md = next(it)         # VMEM [B*T, D]
    s_mt = next(it)         # VMEM [B*T, T]

    x = x_ref[...]
    m = m_ref[...]

    # ---------- first block: TimesBlock-style mixer stack ----------
    # TODO(synk): exact TimesBlock (FFT period detection + inception conv) is
    # not in the provided source; approximated as a residual time-mixing +
    # feature-mixing block with the same (n_features, n_steps) interface.
    h = x
    for (wtT_ref, bt_ref, wf_ref, bf_ref) in mixers:
        wtT = wtT_ref[...]                         # [T, T] (pre-transposed)
        bt = bt_ref[...]                           # [T, 1]
        for b in range(B):
            xb = h[b * T:(b + 1) * T, :]           # [T, F]
            tb = jnp.dot(wtT, xb, preferred_element_type=f32) + bt
            s_mf[b * T:(b + 1) * T, :] = jax.nn.gelu(tb) + xb
        h = s_mf[...]
        fm = jnp.dot(h, wf_ref[...], preferred_element_type=f32) + bf_ref[...]
        h = jax.nn.gelu(fm) + h
    xt1 = h                                        # X_tilde_1  [B*T, F]

    # ---------- second block: X_prime + embedding_2 + positional enc --------
    xp = m * x + (1.0 - m) * xt1
    enc0 = (jnp.dot(xp, emb_w1_ref[...], preferred_element_type=f32)
            + jnp.dot(m, emb_w2_ref[...], preferred_element_type=f32)
            + emb_b_ref[...])
    pos = pos_ref[...]                             # [T, D]
    for b in range(B):
        s_md[b * T:(b + 1) * T, :] = enc0[b * T:(b + 1) * T, :] + pos
    enc = s_md[...]                                # [B*T, D]

    # ---------- encoder layers (pre-LN MHA + FFN; dropout = identity) -------
    inv_temp = 1.0 / math.sqrt(d_k)
    for (ln1g, ln1b, wq_r, wk_r, wv_r, wfc_r,
         ln2g, ln2b, wff1_r, bff1_r, wff2_r, bff2_r) in encs:
        xl = _layer_norm(enc, ln1g[...], ln1b[...])
        for b in range(B):
            xb = xl[b * T:(b + 1) * T, :]          # [T, D]
            yb = enc[b * T:(b + 1) * T, :]         # residual
            a_sum = jnp.zeros((T, T), f32)
            for hh in range(H):                    # static unroll over heads
                qh = jnp.dot(xb, wq_r[hh], preferred_element_type=f32)
                kh = jnp.dot(xb, wk_r[hh], preferred_element_type=f32)
                vh = jnp.dot(xb, wv_r[hh], preferred_element_type=f32)
                s = jax.lax.dot_general(qh, kh, (((1,), (1,)), ((), ())),
                                        preferred_element_type=f32) * inv_temp
                s = s - jnp.max(s, axis=-1, keepdims=True)
                e = jnp.exp(s)
                attn = e / jnp.sum(e, axis=-1, keepdims=True)
                a_sum = a_sum + attn
                ctx = jnp.dot(attn, vh, preferred_element_type=f32)
                yb = yb + jnp.dot(ctx, wfc_r[hh], preferred_element_type=f32)
            s_md[b * T:(b + 1) * T, :] = yb
            s_mt[b * T:(b + 1) * T, :] = a_sum * (1.0 / H)
        enc = s_md[...]
        # position-wise FFN (pre-LN) + residual
        xn = _layer_norm(enc, ln2g[...], ln2b[...])
        hmid = jnp.maximum(
            jnp.dot(xn, wff1_r[...], preferred_element_type=f32) + bff1_r[...], 0.0)
        enc = jnp.dot(hmid, wff2_r[...], preferred_element_type=f32) + bff2_r[...] + enc
    aw = s_mt[...]                                 # head-mean attention of last layer

    # ---------- reduce_dim_beta -> relu -> reduce_dim_gamma -----------------
    beta = jnp.maximum(
        jnp.dot(enc, bw_ref[...], preferred_element_type=f32) + bb_ref[...], 0.0)
    xt2 = jnp.dot(beta, gw_ref[...], preferred_element_type=f32) + gb_ref[...]

    # ---------- weight_combine + sigmoid + X_tilde_3 + X_c ------------------
    logits = (jnp.dot(m, wcm_ref[...], preferred_element_type=f32)
              + jnp.dot(aw, wca_ref[...], preferred_element_type=f32)
              + wcb_ref[...])
    cw = jax.nn.sigmoid(logits)
    xt3 = (1.0 - cw) * xt2 + cw * xt1
    xc = m * x + (1.0 - m) * xt3
    out_ref[...] = xc.astype(out_ref.dtype)

    # ---------- masked-MAE sums (all four cal_mae in one pass) --------------
    xi = xi_ref[...]
    im = im_ref[...]
    sums_ref[0] = jnp.sum(jnp.abs(xt1 - x) * m)
    sums_ref[1] = jnp.sum(jnp.abs(xt2 - x) * m)
    sums_ref[2] = jnp.sum(jnp.abs(xt3 - x) * m)
    sums_ref[3] = jnp.sum(jnp.abs(xt3 - xi) * im)
    sums_ref[4] = jnp.sum(m)
    sums_ref[5] = jnp.sum(im)


# ----------------------------- params / JAX glue ------------------------------

def sinusoid_pos_table(n_position, d_model):
    pos = np.arange(n_position)[:, None].astype(np.float64)
    i = np.arange(d_model)[None, :]
    angle = pos / np.power(10000.0, 2.0 * (i // 2) / d_model)
    table = np.zeros((n_position, d_model), dtype=np.float64)
    table[:, 0::2] = np.sin(angle[:, 0::2])
    table[:, 1::2] = np.cos(angle[:, 1::2])
    return jnp.asarray(table, jnp.float32)


CFG = dict(n_layers=1, n_steps=8, n_features=4, d_model=32, d_inner=32,
           n_heads=2, d_k=16, d_v=16, n_mixer_layers=1,
           ORT_weight=1.0, MIT_weight=1.0)


def init_params(key, cfg):
    T, F = cfg["n_steps"], cfg["n_features"]
    D, DI = cfg["d_model"], cfg["d_inner"]
    H, dk, dv = cfg["n_heads"], cfg["d_k"], cfg["d_v"]
    kit = iter(jax.random.split(key, 64))

    def dense(din, dout):
        w = jax.random.normal(next(kit), (din, dout), jnp.float32) / np.sqrt(din)
        b = jax.random.normal(next(kit), (dout,), jnp.float32) * 0.01
        return w, b

    def headed(h, din, dout):
        return jax.random.normal(next(kit), (h, din, dout), jnp.float32) / np.sqrt(din)

    params = {}
    mixers = []
    for _ in range(cfg["n_mixer_layers"]):
        wt, bt = dense(T, T)
        wf, bf = dense(F, F)
        mixers.append(dict(w_time=wt, b_time=bt, w_feat=wf, b_feat=bf))
    params["mixers"] = mixers

    emb_w, emb_b = dense(2 * F, D)                  # embedding_2
    params["emb_w1"] = emb_w[:F]                    # acts on X_prime
    params["emb_w2"] = emb_w[F:]                    # acts on masks
    params["emb_b"] = emb_b
    params["pos_table"] = sinusoid_pos_table(T, D)  # position_enc

    layers = []
    for _ in range(cfg["n_layers"]):
        lp = dict(
            ln1_g=jnp.ones((D,), jnp.float32), ln1_b=jnp.zeros((D,), jnp.float32),
            w_q=headed(H, D, dk), w_k=headed(H, D, dk), w_v=headed(H, D, dv),
            w_fc=headed(H, dv, D),
            ln2_g=jnp.ones((D,), jnp.float32), ln2_b=jnp.zeros((D,), jnp.float32),
        )
        lp["w_ff1"], lp["b_ff1"] = dense(D, DI)
        lp["w_ff2"], lp["b_ff2"] = dense(DI, D)
        layers.append(lp)
    params["enc_layers"] = layers

    params["beta_w"], params["beta_b"] = dense(D, F)     # reduce_dim_beta
    params["gamma_w"], params["gamma_b"] = dense(F, F)   # reduce_dim_gamma
    wc_w, wc_b = dense(F + T, F)                         # weight_combine
    params["wc_w_m"] = wc_w[:F]                          # acts on masks
    params["wc_w_a"] = wc_w[F:]                          # acts on attn weights
    params["wc_b"] = wc_b
    return params


def make_forward(cfg):
    T, F = cfg["n_steps"], cfg["n_features"]
    D, DI = cfg["d_model"], cfg["d_inner"]
    H, dk, dv = cfg["n_heads"], cfg["d_k"], cfg["d_v"]

    def forward(params, X, masks, X_intact, indicating_mask):
        B = X.shape[0]
        M = B * T
        n_mixer = len(params["mixers"])
        n_enc = len(params["enc_layers"])

        ops = [X.reshape(M, F), masks.reshape(M, F),
               X_intact.reshape(M, F), indicating_mask.reshape(M, F)]
        for mp in params["mixers"]:
            ops += [mp["w_time"].T, mp["b_time"].reshape(T, 1),
                    mp["w_feat"], mp["b_feat"].reshape(1, F)]
        ops += [params["emb_w1"], params["emb_w2"],
                params["emb_b"].reshape(1, D), params["pos_table"]]
        for lp in params["enc_layers"]:
            ops += [lp["ln1_g"].reshape(1, D), lp["ln1_b"].reshape(1, D),
                    lp["w_q"], lp["w_k"], lp["w_v"], lp["w_fc"],
                    lp["ln2_g"].reshape(1, D), lp["ln2_b"].reshape(1, D),
                    lp["w_ff1"], lp["b_ff1"].reshape(1, DI),
                    lp["w_ff2"], lp["b_ff2"].reshape(1, D)]
        ops += [params["beta_w"], params["beta_b"].reshape(1, F),
                params["gamma_w"], params["gamma_b"].reshape(1, F),
                params["wc_w_m"], params["wc_w_a"], params["wc_b"].reshape(1, F)]

        imputed2, sums = pl.pallas_call(
            functools.partial(_maitts_forward_kernel, B=B, T=T, H=H, d_k=dk,
                              n_mixer=n_mixer, n_enc=n_enc),
            out_shape=(jax.ShapeDtypeStruct((M, F), jnp.float32),
                       jax.ShapeDtypeStruct((6,), jnp.float32)),
            in_specs=[_VMEM] * len(ops),
            out_specs=(_VMEM, _SMEM),
            scratch_shapes=[pltpu.VMEM((M, F), jnp.float32),
                            pltpu.VMEM((M, D), jnp.float32),
                            pltpu.VMEM((M, T), jnp.float32)],
        )(*ops)

        # cal_mae normalizations + loss weighting (scalar ops only).
        eps = 1e-12
        ORT_loss = (sums[0] + sums[1] + sums[2]) / (3.0 * (sums[4] + eps))
        MIT_loss = sums[3] / (sums[5] + eps)
        loss = cfg["ORT_weight"] * ORT_loss + cfg["MIT_weight"] * MIT_loss
        return dict(imputed_data=imputed2.reshape(B, T, F),
                    ORT_loss=ORT_loss, MIT_loss=MIT_loss, loss=loss)

    return jax.jit(forward)


# ------------------------------------ main ------------------------------------

if __name__ == "__main__":
    cfg = CFG
    B, T, F = 2, cfg["n_steps"], cfg["n_features"]

    key = jax.random.PRNGKey(0)
    kp, kx, km, ki = jax.random.split(key, 4)
    params = init_params(kp, cfg)

    X_intact = jax.random.normal(kx, (B, T, F), jnp.float32)
    missing_mask = (jax.random.uniform(km, (B, T, F)) > 0.2).astype(jnp.float32)
    indicating_mask = ((jax.random.uniform(ki, (B, T, F)) > 0.7)
                       .astype(jnp.float32)) * missing_mask
    X = X_intact * missing_mask

    fwd = make_forward(cfg)
    out = fwd(params, X, missing_mask, X_intact, indicating_mask)
    jax.block_until_ready(out)

    assert out["imputed_data"].shape == (B, T, F)
    assert np.isfinite(float(out["loss"]))
    assert np.all(np.isfinite(np.asarray(out["imputed_data"])))
    print("KERNEL_OK")
</pallas_src>

<mosaic_0001>
module attributes {stable_mosaic.version = 11 : i64} {
  func.func @_maitts_forward_kernel(%arg0: memref<16x4xf32, #tpu.memory_space<vmem>>, %arg1: memref<16x4xf32, #tpu.memory_space<vmem>>, %arg2: memref<16x4xf32, #tpu.memory_space<vmem>>, %arg3: memref<16x4xf32, #tpu.memory_space<vmem>>, %arg4: memref<8x8xf32, #tpu.memory_space<vmem>>, %arg5: memref<8x1xf32, #tpu.memory_space<vmem>>, %arg6: memref<4x4xf32, #tpu.memory_space<vmem>>, %arg7: memref<1x4xf32, #tpu.memory_space<vmem>>, %arg8: memref<4x32xf32, #tpu.memory_space<vmem>>, %arg9: memref<4x32xf32, #tpu.memory_space<vmem>>, %arg10: memref<1x32xf32, #tpu.memory_space<vmem>>, %arg11: memref<8x32xf32, #tpu.memory_space<vmem>>, %arg12: memref<1x32xf32, #tpu.memory_space<vmem>>, %arg13: memref<1x32xf32, #tpu.memory_space<vmem>>, %arg14: memref<2x32x16xf32, #tpu.memory_space<vmem>>, %arg15: memref<2x32x16xf32, #tpu.memory_space<vmem>>, %arg16: memref<2x32x16xf32, #tpu.memory_space<vmem>>, %arg17: memref<2x16x32xf32, #tpu.memory_space<vmem>>, %arg18: memref<1x32xf32, #tpu.memory_space<vmem>>, %arg19: memref<1x32xf32, #tpu.memory_space<vmem>>, %arg20: memref<32x32xf32, #tpu.memory_space<vmem>>, %arg21: memref<1x32xf32, #tpu.memory_space<vmem>>, %arg22: memref<32x32xf32, #tpu.memory_space<vmem>>, %arg23: memref<1x32xf32, #tpu.memory_space<vmem>>, %arg24: memref<32x4xf32, #tpu.memory_space<vmem>>, %arg25: memref<1x4xf32, #tpu.memory_space<vmem>>, %arg26: memref<4x4xf32, #tpu.memory_space<vmem>>, %arg27: memref<1x4xf32, #tpu.memory_space<vmem>>, %arg28: memref<4x4xf32, #tpu.memory_space<vmem>>, %arg29: memref<8x4xf32, #tpu.memory_space<vmem>>, %arg30: memref<1x4xf32, #tpu.memory_space<vmem>>, %arg31: memref<16x4xf32, #tpu.memory_space<vmem>>, %arg32: memref<6xf32, #tpu.memory_space<smem>>, %arg33: memref<16x4xf32, #tpu.memory_space<vmem>>, %arg34: memref<16x32xf32, #tpu.memory_space<vmem>>, %arg35: memref<16x8xf32, #tpu.memory_space<vmem>>) attributes {dimension_semantics = [], scalar_prefetch = 0 : i64, scratch_operands = 3 : i64, tpu.core_type = #tpu.core_type<tc>} {
    %c0 = arith.constant 0 : index
    %c0_0 = arith.constant 0 : index
    %0 = vector.load %arg0[%c0, %c0_0] : memref<16x4xf32, #tpu.memory_space<vmem>>, vector<16x4xf32>
    %c0_1 = arith.constant 0 : index
    %c0_2 = arith.constant 0 : index
    %1 = vector.load %arg1[%c0_1, %c0_2] : memref<16x4xf32, #tpu.memory_space<vmem>>, vector<16x4xf32>
    %c0_3 = arith.constant 0 : index
    %c0_4 = arith.constant 0 : index
    %2 = vector.load %arg4[%c0_3, %c0_4] : memref<8x8xf32, #tpu.memory_space<vmem>>, vector<8x8xf32>
    %c0_5 = arith.constant 0 : index
    %c0_6 = arith.constant 0 : index
    %3 = vector.load %arg5[%c0_5, %c0_6] : memref<8x1xf32, #tpu.memory_space<vmem>>, vector<8x1xf32>
    %4 = vector.extract_strided_slice %0 {offsets = [0, 0], sizes = [8, 4], strides = [1, 1]} : vector<16x4xf32> to vector<8x4xf32>
    %cst = arith.constant dense<0.000000e+00> : vector<8x4xf32>
    %5 = tpu.matmul %2, %4, %cst {dimension_numbers = #tpu.dot_dimension_numbers<[1], [0], [0], [1], [0, 0, 1, 1], [], []>} : vector<8x8xf32>, vector<8x4xf32>, vector<8x4xf32> -> vector<8x4xf32>
    %6 = vector.broadcast %3 : vector<8x1xf32> to vector<8x4xf32>
    %7 = arith.addf %5, %6 : vector<8x4xf32>
    %8 = arith.mulf %7, %7 : vector<8x4xf32>
    %9 = arith.mulf %7, %8 : vector<8x4xf32>
    %cst_7 = arith.constant 4.471500e-02 : f32
    %10 = vector.broadcast %cst_7 : f32 to vector<8x4xf32>
    %11 = arith.mulf %10, %9 : vector<8x4xf32>
    %12 = arith.addf %7, %11 : vector<8x4xf32>
    %cst_8 = arith.constant 0.797884583 : f32
    %13 = vector.broadcast %cst_8 : f32 to vector<8x4xf32>
    %14 = arith.mulf %13, %12 : vector<8x4xf32>
    %15 = math.tanh %14 : vector<8x4xf32>
    %cst_9 = arith.constant 1.000000e+00 : f32
    %16 = vector.broadcast %cst_9 : f32 to vector<8x4xf32>
    %17 = arith.addf %16, %15 : vector<8x4xf32>
    %cst_10 = arith.constant 5.000000e-01 : f32
    %18 = vector.broadcast %cst_10 : f32 to vector<8x4xf32>
    %19 = arith.mulf %18, %17 : vector<8x4xf32>
    %20 = arith.mulf %7, %19 : vector<8x4xf32>
    %21 = arith.addf %20, %4 : vector<8x4xf32>
    %c0_11 = arith.constant 0 : index
    %c0_12 = arith.constant 0 : index
    %22 = vector.load %arg33[%c0_11, %c0_12] : memref<16x4xf32, #tpu.memory_space<vmem>>, vector<8x4xf32>
    tpu.vector_store %arg33[%c0_11, %c0_12], %21 {strides = array<i32>} : memref<16x4xf32, #tpu.memory_space<vmem>>, vector<8x4xf32>,
    %23 = vector.extract_strided_slice %0 {offsets = [8, 0], sizes = [8, 4], strides = [1, 1]} : vector<16x4xf32> to vector<8x4xf32>
    %cst_13 = arith.constant dense<0.000000e+00> : vector<8x4xf32>
    %24 = tpu.matmul %2, %23, %cst_13 {dimension_numbers = #tpu.dot_dimension_numbers<[1], [0], [0], [1], [0, 0, 1, 1], [], []>} : vector<8x8xf32>, vector<8x4xf32>, vector<8x4xf32> -> vector<8x4xf32>
    %25 = vector.broadcast %3 : vector<8x1xf32> to vector<8x4xf32>
    %26 = arith.addf %24, %25 : vector<8x4xf32>
    %27 = arith.mulf %26, %26 : vector<8x4xf32>
    %28 = arith.mulf %26, %27 : vector<8x4xf32>
    %cst_14 = arith.constant 4.471500e-02 : f32
    %29 = vector.broadcast %cst_14 : f32 to vector<8x4xf32>
    %30 = arith.mulf %29, %28 : vector<8x4xf32>
    %31 = arith.addf %26, %30 : vector<8x4xf32>
    %cst_15 = arith.constant 0.797884583 : f32
    %32 = vector.broadcast %cst_15 : f32 to vector<8x4xf32>
    %33 = arith.mulf %32, %31 : vector<8x4xf32>
    %34 = math.tanh %33 : vector<8x4xf32>
    %cst_16 = arith.constant 1.000000e+00 : f32
    %35 = vector.broadcast %cst_16 : f32 to vector<8x4xf32>
    %36 = arith.addf %35, %34 : vector<8x4xf32>
    %cst_17 = arith.constant 5.000000e-01 : f32
    %37 = vector.broadcast %cst_17 : f32 to vector<8x4xf32>
    %38 = arith.mulf %37, %36 : vector<8x4xf32>
    %39 = arith.mulf %26, %38 : vector<8x4xf32>
    %40 = arith.addf %39, %23 : vector<8x4xf32>
    %c8 = arith.constant 8 : index
    %c0_18 = arith.constant 0 : index
    %41 = vector.load %arg33[%c8, %c0_18] : memref<16x4xf32, #tpu.memory_space<vmem>>, vector<8x4xf32>
    tpu.vector_store %arg33[%c8, %c0_18], %40 {strides = array<i32>} : memref<16x4xf32, #tpu.memory_space<vmem>>, vector<8x4xf32>,
    %c0_19 = arith.constant 0 : index
    %c0_20 = arith.constant 0 : index
    %42 = vector.load %arg33[%c0_19, %c0_20] : memref<16x4xf32, #tpu.memory_space<vmem>>, vector<16x4xf32>
    %c0_21 = arith.constant 0 : index
    %c0_22 = arith.constant 0 : index
    %43 = vector.load %arg6[%c0_21, %c0_22] : memref<4x4xf32, #tpu.memory_space<vmem>>, vector<4x4xf32>
    %cst_23 = arith.constant dense<0.000000e+00> : vector<16x4xf32>
    %44 = tpu.matmul %42, %43, %cst_23 {dimension_numbers = #tpu.dot_dimension_numbers<[1], [0], [0], [1], [0, 0, 1, 1], [], []>} : vector<16x4xf32>, vector<4x4xf32>, vector<16x4xf32> -> vector<16x4xf32>
    %c0_24 = arith.constant 0 : index
    %c0_25 = arith.constant 0 : index
    %45 = vector.load %arg7[%c0_24, %c0_25] : memref<1x4xf32, #tpu.memory_space<vmem>>, vector<1x4xf32>
    %46 = vector.broadcast %45 : vector<1x4xf32> to vector<16x4xf32>
    %47 = arith.addf %44, %46 : vector<16x4xf32>
    %48 = arith.mulf %47, %47 : vector<16x4xf32>
    %49 = arith.mulf %47, %48 : vector<16x4xf32>
    %cst_26 = arith.constant 4.471500e-02 : f32
    %50 = vector.broadcast %cst_26 : f32 to vector<16x4xf32>
    %51 = arith.mulf %50, %49 : vector<16x4xf32>
    %52 = arith.addf %47, %51 : vector<16x4xf32>
    %cst_27 = arith.constant 0.797884583 : f32
    %53 = vector.broadcast %cst_27 : f32 to vector<16x4xf32>
    %54 = arith.mulf %53, %52 : vector<16x4xf32>
    %55 = math.tanh %54 : vector<16x4xf32>
    %cst_28 = arith.constant 1.000000e+00 : f32
    %56 = vector.broadcast %cst_28 : f32 to vector<16x4xf32>
    %57 = arith.addf %56, %55 : vector<16x4xf32>
    %cst_29 = arith.constant 5.000000e-01 : f32
    %58 = vector.broadcast %cst_29 : f32 to vector<16x4xf32>
    %59 = arith.mulf %58, %57 : vector<16x4xf32>
    %60 = arith.mulf %47, %59 : vector<16x4xf32>
    %61 = arith.addf %60, %42 : vector<16x4xf32>
    %62 = arith.mulf %1, %0 : vector<16x4xf32>
    %cst_30 = arith.constant 1.000000e+00 : f32
    %63 = vector.broadcast %cst_30 : f32 to vector<16x4xf32>
    %64 = arith.subf %63, %1 : vector<16x4xf32>
    %65 = arith.mulf %64, %61 : vector<16x4xf32>
    %66 = arith.addf %62, %65 : vector<16x4xf32>
    %c0_31 = arith.constant 0 : index
    %c0_32 = arith.constant 0 : index
    %67 = vector.load %arg8[%c0_31, %c0_32] : memref<4x32xf32, #tpu.memory_space<vmem>>, vector<4x32xf32>
    %cst_33 = arith.constant dense<0.000000e+00> : vector<16x32xf32>
    %68 = tpu.matmul %66, %67, %cst_33 {dimension_numbers = #tpu.dot_dimension_numbers<[1], [0], [0], [1], [0, 0, 1, 1], [], []>} : vector<16x4xf32>, vector<4x32xf32>, vector<16x32xf32> -> vector<16x32xf32>
    %c0_34 = arith.constant 0 : index
    %c0_35 = arith.constant 0 : index
    %69 = vector.load %arg9[%c0_34, %c0_35] : memref<4x32xf32, #tpu.memory_space<vmem>>, vector<4x32xf32>
    %cst_36 = arith.constant dense<0.000000e+00> : vector<16x32xf32>
    %70 = tpu.matmul %1, %69, %cst_36 {dimension_numbers = #tpu.dot_dimension_numbers<[1], [0], [0], [1], [0, 0, 1, 1], [], []>} : vector<16x4xf32>, vector<4x32xf32>, vector<16x32xf32> -> vector<16x32xf32>
    %71 = arith.addf %68, %70 : vector<16x32xf32>
    %c0_37 = arith.constant 0 : index
    %c0_38 = arith.constant 0 : index
    %72 = vector.load %arg10[%c0_37, %c0_38] : memref<1x32xf32, #tpu.memory_space<vmem>>, vector<1x32xf32>
    %73 = vector.broadcast %72 : vector<1x32xf32> to vector<16x32xf32>
    %74 = arith.addf %71, %73 : vector<16x32xf32>
    %c0_39 = arith.constant 0 : index
    %c0_40 = arith.constant 0 : index
    %75 = vector.load %arg11[%c0_39, %c0_40] : memref<8x32xf32, #tpu.memory_space<vmem>>, vector<8x32xf32>
    %76 = vector.extract_strided_slice %74 {offsets = [0, 0], sizes = [8, 32], strides = [1, 1]} : vector<16x32xf32> to vector<8x32xf32>
    %77 = arith.addf %76, %75 : vector<8x32xf32>
    %c0_41 = arith.constant 0 : index
    %c0_42 = arith.constant 0 : index
    %78 = vector.load %arg34[%c0_41, %c0_42] : memref<16x32xf32, #tpu.memory_space<vmem>>, vector<8x32xf32>
    tpu.vector_store %arg34[%c0_41, %c0_42], %77 {strides = array<i32>} : memref<16x32xf32, #tpu.memory_space<vmem>>, vector<8x32xf32>,
    %79 = vector.extract_strided_slice %74 {offsets = [8, 0], sizes = [8, 32], strides = [1, 1]} : vector<16x32xf32> to vector<8x32xf32>
    %80 = arith.addf %79, %75 : vector<8x32xf32>
    %c8_43 = arith.constant 8 : index
    %c0_44 = arith.constant 0 : index
    %81 = vector.load %arg34[%c8_43, %c0_44] : memref<16x32xf32, #tpu.memory_space<vmem>>, vector<8x32xf32>
    tpu.vector_store %arg34[%c8_43, %c0_44], %80 {strides = array<i32>} : memref<16x32xf32, #tpu.memory_space<vmem>>, vector<8x32xf32>,
    %c0_45 = arith.constant 0 : index
    %c0_46 = arith.constant 0 : index
    %82 = vector.load %arg34[%c0_45, %c0_46] : memref<16x32xf32, #tpu.memory_space<vmem>>, vector<16x32xf32>
    %c0_47 = arith.constant 0 : index
    %c0_48 = arith.constant 0 : index
    %83 = vector.load %arg12[%c0_47, %c0_48] : memref<1x32xf32, #tpu.memory_space<vmem>>, vector<1x32xf32>
    %c0_49 = arith.constant 0 : index
    %c0_50 = arith.constant 0 : index
    %84 = vector.load %arg13[%c0_49, %c0_50] : memref<1x32xf32, #tpu.memory_space<vmem>>, vector<1x32xf32>
    %cst_51 = arith.constant dense<0.000000e+00> : vector<16xf32>
    %85 = vector.multi_reduction <add>, %82, %cst_51 [1] : vector<16x32xf32> to vector<16xf32>
    %86 = vector.shape_cast %85 : vector<16xf32> to vector<16x1xf32>
    %cst_52 = arith.constant 3.200000e+01 : f32
    %87 = vector.broadcast %cst_52 : f32 to vector<16x1xf32>
    %88 = arith.divf %86, %87 : vector<16x1xf32>
    %89 = vector.broadcast %88 : vector<16x1xf32> to vector<16x32xf32>
    %90 = arith.subf %82, %89 : vector<16x32xf32>
    %91 = arith.mulf %90, %90 : vector<16x32xf32>
    %cst_53 = arith.constant dense<0.000000e+00> : vector<16xf32>
    %92 = vector.multi_reduction <add>, %91, %cst_53 [1] : vector<16x32xf32> to vector<16xf32>
    %93 = vector.shape_cast %92 : vector<16xf32> to vector<16x1xf32>
    %cst_54 = arith.constant 3.200000e+01 : f32
    %94 = vector.broadcast %cst_54 : f32 to vector<16x1xf32>
    %95 = arith.divf %93, %94 : vector<16x1xf32>
    %96 = vector.broadcast %88 : vector<16x1xf32> to vector<16x32xf32>
    %97 = arith.subf %82, %96 : vector<16x32xf32>
    %cst_55 = arith.constant 9.99999974E-6 : f32
    %98 = vector.broadcast %cst_55 : f32 to vector<16x1xf32>
    %99 = arith.addf %95, %98 : vector<16x1xf32>
    %100 = math.rsqrt %99 : vector<16x1xf32>
    %101 = vector.broadcast %100 : vector<16x1xf32> to vector<16x32xf32>
    %102 = arith.mulf %97, %101 : vector<16x32xf32>
    %103 = vector.broadcast %83 : vector<1x32xf32> to vector<16x32xf32>
    %104 = arith.mulf %102, %103 : vector<16x32xf32>
    %105 = vector.broadcast %84 : vector<1x32xf32> to vector<16x32xf32>
    %106 = arith.addf %104, %105 : vector<16x32xf32>
    %107 = vector.extract_strided_slice %106 {offsets = [0, 0], sizes = [8, 32], strides = [1, 1]} : vector<16x32xf32> to vector<8x32xf32>
    %108 = vector.extract_strided_slice %82 {offsets = [0, 0], sizes = [8, 32], strides = [1, 1]} : vector<16x32xf32> to vector<8x32xf32>
    %cst_56 = arith.constant 0.000000e+00 : f32
    %109 = vector.broadcast %cst_56 : f32 to vector<8x8xf32>
    %c0_57 = arith.constant 0 : index
    %c0_58 = arith.constant 0 : index
    %c0_59 = arith.constant 0 : index
    %110 = vector.load %arg14[%c0_57, %c0_58, %c0_59] : memref<2x32x16xf32, #tpu.memory_space<vmem>>, vector<1x32x16xf32>
    %111 = vector.shape_cast %110 : vector<1x32x16xf32> to vector<32x16xf32>
    %cst_60 = arith.constant dense<0.000000e+00> : vector<8x16xf32>
    %112 = tpu.matmul %107, %111, %cst_60 {dimension_numbers = #tpu.dot_dimension_numbers<[1], [0], [0], [1], [0, 0, 1, 1], [], []>} : vector<8x32xf32>, vector<32x16xf32>, vector<8x16xf32> -> vector<8x16xf32>
    %c0_61 = arith.constant 0 : index
    %c0_62 = arith.constant 0 : index
    %c0_63 = arith.constant 0 : index
    %113 = vector.load %arg15[%c0_61, %c0_62, %c0_63] : memref<2x32x16xf32, #tpu.memory_space<vmem>>, vector<1x32x16xf32>
    %114 = vector.shape_cast %113 : vector<1x32x16xf32> to vector<32x16xf32>
    %cst_64 = arith.constant dense<0.000000e+00> : vector<8x16xf32>
    %115 = tpu.matmul %107, %114, %cst_64 {dimension_numbers = #tpu.dot_dimension_numbers<[1], [0], [0], [1], [0, 0, 1, 1], [], []>} : vector<8x32xf32>, vector<32x16xf32>, vector<8x16xf32> -> vector<8x16xf32>
    %c0_65 = arith.constant 0 : index
    %c0_66 = arith.constant 0 : index
    %c0_67 = arith.constant 0 : index
    %116 = vector.load %arg16[%c0_65, %c0_66, %c0_67] : memref<2x32x16xf32, #tpu.memory_space<vmem>>, vector<1x32x16xf32>
    %117 = vector.shape_cast %116 : vector<1x32x16xf32> to vector<32x16xf32>
    %cst_68 = arith.constant dense<0.000000e+00> : vector<8x16xf32>
    %118 = tpu.matmul %107, %117, %cst_68 {dimension_numbers = #tpu.dot_dimension_numbers<[1], [0], [0], [1], [0, 0, 1, 1], [], []>} : vector<8x32xf32>, vector<32x16xf32>, vector<8x16xf32> -> vector<8x16xf32>
    %cst_69 = arith.constant dense<0.000000e+00> : vector<8x8xf32>
    %119 = tpu.matmul %112, %115, %cst_69 {dimension_numbers = #tpu.dot_dimension_numbers<[1], [1], [0], [0], [0, 0, 1, 0], [], []>} : vector<8x16xf32>, vector<8x16xf32>, vector<8x8xf32> -> vector<8x8xf32>
    %cst_70 = arith.constant 2.500000e-01 : f32
    %120 = vector.broadcast %cst_70 : f32 to vector<8x8xf32>
    %121 = arith.mulf %119, %120 : vector<8x8xf32>
    %cst_71 = arith.constant dense<0xFF800000> : vector<8xf32>
    %122 = vector.multi_reduction <maximumf>, %121, %cst_71 [1] : vector<8x8xf32> to vector<8xf32>
    %123 = vector.shape_cast %122 : vector<8xf32> to vector<8x1xf32>
    %124 = vector.broadcast %123 : vector<8x1xf32> to vector<8x8xf32>
    %125 = arith.subf %121, %124 : vector<8x8xf32>
    %126 = math.exp %125 : vector<8x8xf32>
    %cst_72 = arith.constant dense<0.000000e+00> : vector<8xf32>
    %127 = vector.multi_reduction <add>, %126, %cst_72 [1] : vector<8x8xf32> to vector<8xf32>
    %128 = vector.shape_cast %127 : vector<8xf32> to vector<8x1xf32>
    %129 = vector.broadcast %128 : vector<8x1xf32> to vector<8x8xf32>
    %130 = arith.divf %126, %129 : vector<8x8xf32>
    %131 = arith.addf %109, %130 : vector<8x8xf32>
    %cst_73 = arith.constant dense<0.000000e+00> : vector<8x16xf32>
    %132 = tpu.matmul %130, %118, %cst_73 {dimension_numbers = #tpu.dot_dimension_numbers<[1], [0], [0], [1], [0, 0, 1, 1], [], []>} : vector<8x8xf32>, vector<8x16xf32>, vector<8x16xf32> -> vector<8x16xf32>
    %c0_74 = arith.constant 0 : index
    %c0_75 = arith.constant 0 : index
    %c0_76 = arith.constant 0 : index
    %133 = vector.load %arg17[%c0_74, %c0_75, %c0_76] : memref<2x16x32xf32, #tpu.memory_space<vmem>>, vector<1x16x32xf32>
    %134 = vector.shape_cast %133 : vector<1x16x32xf32> to vector<16x32xf32>
    %cst_77 = arith.constant dense<0.000000e+00> : vector<8x32xf32>
    %135 = tpu.matmul %132, %134, %cst_77 {dimension_numbers = #tpu.dot_dimension_numbers<[1], [0], [0], [1], [0, 0, 1, 1], [], []>} : vector<8x16xf32>, vector<16x32xf32>, vector<8x32xf32> -> vector<8x32xf32>
    %136 = arith.addf %108, %135 : vector<8x32xf32>
    %c1 = arith.constant 1 : index
    %c0_78 = arith.constant 0 : index
    %c0_79 = arith.constant 0 : index
    %137 = vector.load %arg14[%c1, %c0_78, %c0_79] : memref<2x32x16xf32, #tpu.memory_space<vmem>>, vector<1x32x16xf32>
    %138 = vector.shape_cast %137 : vector<1x32x16xf32> to vector<32x16xf32>
    %cst_80 = arith.constant dense<0.000000e+00> : vector<8x16xf32>
    %139 = tpu.matmul %107, %138, %cst_80 {dimension_numbers = #tpu.dot_dimension_numbers<[1], [0], [0], [1], [0, 0, 1, 1], [], []>} : vector<8x32xf32>, vector<32x16xf32>, vector<8x16xf32> -> vector<8x16xf32>
    %c1_81 = arith.constant 1 : index
    %c0_82 = arith.constant 0 : index
    %c0_83 = arith.constant 0 : index
    %140 = vector.load %arg15[%c1_81, %c0_82, %c0_83] : memref<2x32x16xf32, #tpu.memory_space<vmem>>, vector<1x32x16xf32>
    %141 = vector.shape_cast %140 : vector<1x32x16xf32> to vector<32x16xf32>
    %cst_84 = arith.constant dense<0.000000e+00> : vector<8x16xf32>
    %142 = tpu.matmul %107, %141, %cst_84 {dimension_numbers = #tpu.dot_dimension_numbers<[1], [0], [0], [1], [0, 0, 1, 1], [], []>} : vector<8x32xf32>, vector<32x16xf32>, vector<8x16xf32> -> vector<8x16xf32>
    %c1_85 = arith.constant 1 : index
    %c0_86 = arith.constant 0 : index
    %c0_87 = arith.constant 0 : index
    %143 = vector.load %arg16[%c1_85, %c0_86, %c0_87] : memref<2x32x16xf32, #tpu.memory_space<vmem>>, vector<1x32x16xf32>
    %144 = vector.shape_cast %143 : vector<1x32x16xf32> to vector<32x16xf32>
    %cst_88 = arith.constant dense<0.000000e+00> : vector<8x16xf32>
    %145 = tpu.matmul %107, %144, %cst_88 {dimension_numbers = #tpu.dot_dimension_numbers<[1], [0], [0], [1], [0, 0, 1, 1], [], []>} : vector<8x32xf32>, vector<32x16xf32>, vector<8x16xf32> -> vector<8x16xf32>
    %cst_89 = arith.constant dense<0.000000e+00> : vector<8x8xf32>
    %146 = tpu.matmul %139, %142, %cst_89 {dimension_numbers = #tpu.dot_dimension_numbers<[1], [1], [0], [0], [0, 0, 1, 0], [], []>} : vector<8x16xf32>, vector<8x16xf32>, vector<8x8xf32> -> vector<8x8xf32>
    %cst_90 = arith.constant 2.500000e-01 : f32
    %147 = vector.broadcast %cst_90 : f32 to vector<8x8xf32>
    %148 = arith.mulf %146, %147 : vector<8x8xf32>
    %cst_91 = arith.constant dense<0xFF800000> : vector<8xf32>
    %149 = vector.multi_reduction <maximumf>, %148, %cst_91 [1] : vector<8x8xf32> to vector<8xf32>
    %150 = vector.shape_cast %149 : vector<8xf32> to vector<8x1xf32>
    %151 = vector.broadcast %150 : vector<8x1xf32> to vector<8x8xf32>
    %152 = arith.subf %148, %151 : vector<8x8xf32>
    %153 = math.exp %152 : vector<8x8xf32>
    %cst_92 = arith.constant dense<0.000000e+00> : vector<8xf32>
    %154 = vector.multi_reduction <add>, %153, %cst_92 [1] : vector<8x8xf32> to vector<8xf32>
    %155 = vector.shape_cast %154 : vector<8xf32> to vector<8x1xf32>
    %156 = vector.broadcast %155 : vector<8x1xf32> to vector<8x8xf32>
    %157 = arith.divf %153, %156 : vector<8x8xf32>
    %158 = arith.addf %131, %157 : vector<8x8xf32>
    %cst_93 = arith.constant dense<0.000000e+00> : vector<8x16xf32>
    %159 = tpu.matmul %157, %145, %cst_93 {dimension_numbers = #tpu.dot_dimension_numbers<[1], [0], [0], [1], [0, 0, 1, 1], [], []>} : vector<8x8xf32>, vector<8x16xf32>, vector<8x16xf32> -> vector<8x16xf32>
    %c1_94 = arith.constant 1 : index
    %c0_95 = arith.constant 0 : index
    %c0_96 = arith.constant 0 : index
    %160 = vector.load %arg17[%c1_94, %c0_95, %c0_96] : memref<2x16x32xf32, #tpu.memory_space<vmem>>, vector<1x16x32xf32>
    %161 = vector.shape_cast %160 : vector<1x16x32xf32> to vector<16x32xf32>
    %cst_97 = arith.constant dense<0.000000e+00> : vector<8x32xf32>
    %162 = tpu.matmul %159, %161, %cst_97 {dimension_numbers = #tpu.dot_dimension_numbers<[1], [0], [0], [1], [0, 0, 1, 1], [], []>} : vector<8x16xf32>, vector<16x32xf32>, vector<8x32xf32> -> vector<8x32xf32>
    %163 = arith.addf %136, %162 : vector<8x32xf32>
    %c0_98 = arith.constant 0 : index
    %c0_99 = arith.constant 0 : index
    %164 = vector.load %arg34[%c0_98, %c0_99] : memref<16x32xf32, #tpu.memory_space<vmem>>, vector<8x32xf32>
    tpu.vector_store %arg34[%c0_98, %c0_99], %163 {strides = array<i32>} : memref<16x32xf32, #tpu.memory_space<vmem>>, vector<8x32xf32>,
    %cst_100 = arith.constant 5.000000e-01 : f32
    %165 = vector.broadcast %cst_100 : f32 to vector<8x8xf32>
    %166 = arith.mulf %158, %165 : vector<8x8xf32>
    %c0_101 = arith.constant 0 : index
    %c0_102 = arith.constant 0 : index
    %167 = vector.load %arg35[%c0_101, %c0_102] : memref<16x8xf32, #tpu.memory_space<vmem>>, vector<8x8xf32>
    tpu.vector_store %arg35[%c0_101, %c0_102], %166 {strides = array<i32>} : memref<16x8xf32, #tpu.memory_space<vmem>>, vector<8x8xf32>,
    %168 = vector.extract_strided_slice %106 {offsets = [8, 0], sizes = [8, 32], strides = [1, 1]} : vector<16x32xf32> to vector<8x32xf32>
    %169 = vector.extract_strided_slice %82 {offsets = [8, 0], sizes = [8, 32], strides = [1, 1]} : vector<16x32xf32> to vector<8x32xf32>
    %cst_103 = arith.constant 0.000000e+00 : f32
    %170 = vector.broadcast %cst_103 : f32 to vector<8x8xf32>
    %c0_104 = arith.constant 0 : index
    %c0_105 = arith.constant 0 : index
    %c0_106 = arith.constant 0 : index
    %171 = vector.load %arg14[%c0_104, %c0_105, %c0_106] : memref<2x32x16xf32, #tpu.memory_space<vmem>>, vector<1x32x16xf32>
    %172 = vector.shape_cast %171 : vector<1x32x16xf32> to vector<32x16xf32>
    %cst_107 = arith.constant dense<0.000000e+00> : vector<8x16xf32>
    %173 = tpu.matmul %168, %172, %cst_107 {dimension_numbers = #tpu.dot_dimension_numbers<[1], [0], [0], [1], [0, 0, 1, 1], [], []>} : vector<8x32xf32>, vector<32x16xf32>, vector<8x16xf32> -> vector<8x16xf32>
    %c0_108 = arith.constant 0 : index
    %c0_109 = arith.constant 0 : index
    %c0_110 = arith.constant 0 : index
    %174 = vector.load %arg15[%c0_108, %c0_109, %c0_110] : memref<2x32x16xf32, #tpu.memory_space<vmem>>, vector<1x32x16xf32>
    %175 = vector.shape_cast %174 : vector<1x32x16xf32> to vector<32x16xf32>
    %cst_111 = arith.constant dense<0.000000e+00> : vector<8x16xf32>
    %176 = tpu.matmul %168, %175, %cst_111 {dimension_numbers = #tpu.dot_dimension_numbers<[1], [0], [0], [1], [0, 0, 1, 1], [], []>} : vector<8x32xf32>, vector<32x16xf32>, vector<8x16xf32> -> vector<8x16xf32>
    %c0_112 = arith.constant 0 : index
    %c0_113 = arith.constant 0 : index
    %c0_114 = arith.constant 0 : index
    %177 = vector.load %arg16[%c0_112, %c0_113, %c0_114] : memref<2x32x16xf32, #tpu.memory_space<vmem>>, vector<1x32x16xf32>
    %178 = vector.shape_cast %177 : vector<1x32x16xf32> to vector<32x16xf32>
    %cst_115 = arith.constant dense<0.000000e+00> : vector<8x16xf32>
    %179 = tpu.matmul %168, %178, %cst_115 {dimension_numbers = #tpu.dot_dimension_numbers<[1], [0], [0], [1], [0, 0, 1, 1], [], []>} : vector<8x32xf32>, vector<32x16xf32>, vector<8x16xf32> -> vector<8x16xf32>
    %cst_116 = arith.constant dense<0.000000e+00> : vector<8x8xf32>
    %180 = tpu.matmul %173, %176, %cst_116 {dimension_numbers = #tpu.dot_dimension_numbers<[1], [1], [0], [0], [0, 0, 1, 0], [], []>} : vector<8x16xf32>, vector<8x16xf32>, vector<8x8xf32> -> vector<8x8xf32>
    %cst_117 = arith.constant 2.500000e-01 : f32
    %181 = vector.broadcast %cst_117 : f32 to vector<8x8xf32>
    %182 = arith.mulf %180, %181 : vector<8x8xf32>
    %cst_118 = arith.constant dense<0xFF800000> : vector<8xf32>
    %183 = vector.multi_reduction <maximumf>, %182, %cst_118 [1] : vector<8x8xf32> to vector<8xf32>
    %184 = vector.shape_cast %183 : vector<8xf32> to vector<8x1xf32>
    %185 = vector.broadcast %184 : vector<8x1xf32> to vector<8x8xf32>
    %186 = arith.subf %182, %185 : vector<8x8xf32>
    %187 = math.exp %186 : vector<8x8xf32>
    %cst_119 = arith.constant dense<0.000000e+00> : vector<8xf32>
    %188 = vector.multi_reduction <add>, %187, %cst_119 [1] : vector<8x8xf32> to vector<8xf32>
    %189 = vector.shape_cast %188 : vector<8xf32> to vector<8x1xf32>
    %190 = vector.broadcast %189 : vector<8x1xf32> to vector<8x8xf32>
    %191 = arith.divf %187, %190 : vector<8x8xf32>
    %192 = arith.addf %170, %191 : vector<8x8xf32>
    %cst_120 = arith.constant dense<0.000000e+00> : vector<8x16xf32>
    %193 = tpu.matmul %191, %179, %cst_120 {dimension_numbers = #tpu.dot_dimension_numbers<[1], [0], [0], [1], [0, 0, 1, 1], [], []>} : vector<8x8xf32>, vector<8x16xf32>, vector<8x16xf32> -> vector<8x16xf32>
    %c0_121 = arith.constant 0 : index
    %c0_122 = arith.constant 0 : index
    %c0_123 = arith.constant 0 : index
    %194 = vector.load %arg17[%c0_121, %c0_122, %c0_123] : memref<2x16x32xf32, #tpu.memory_space<vmem>>, vector<1x16x32xf32>
    %195 = vector.shape_cast %194 : vector<1x16x32xf32> to vector<16x32xf32>
    %cst_124 = arith.constant dense<0.000000e+00> : vector<8x32xf32>
    %196 = tpu.matmul %193, %195, %cst_124 {dimension_numbers = #tpu.dot_dimension_numbers<[1], [0], [0], [1], [0, 0, 1, 1], [], []>} : vector<8x16xf32>, vector<16x32xf32>, vector<8x32xf32> -> vector<8x32xf32>
    %197 = arith.addf %169, %196 : vector<8x32xf32>
    %c1_125 = arith.constant 1 : index
    %c0_126 = arith.constant 0 : index
    %c0_127 = arith.constant 0 : index
    %198 = vector.load %arg14[%c1_125, %c0_126, %c0_127] : memref<2x32x16xf32, #tpu.memory_space<vmem>>, vector<1x32x16xf32>
    %199 = vector.shape_cast %198 : vector<1x32x16xf32> to vector<32x16xf32>
    %cst_128 = arith.constant dense<0.000000e+00> : vector<8x16xf32>
    %200 = tpu.matmul %168, %199, %cst_128 {dimension_numbers = #tpu.dot_dimension_numbers<[1], [0], [0], [1], [0, 0, 1, 1], [], []>} : vector<8x32xf32>, vector<32x16xf32>, vector<8x16xf32> -> vector<8x16xf32>
    %c1_129 = arith.constant 1 : index
    %c0_130 = arith.constant 0 : index
    %c0_131 = arith.constant 0 : index
    %201 = vector.load %arg15[%c1_129, %c0_130, %c0_131] : memref<2x32x16xf32, #tpu.memory_space<vmem>>, vector<1x32x16xf32>
    %202 = vector.shape_cast %201 : vector<1x32x16xf32> to vector<32x16xf32>
    %cst_132 = arith.constant dense<0.000000e+00> : vector<8x16xf32>
    %203 = tpu.matmul %168, %202, %cst_132 {dimension_numbers = #tpu.dot_dimension_numbers<[1], [0], [0], [1], [0, 0, 1, 1], [], []>} : vector<8x32xf32>, vector<32x16xf32>, vector<8x16xf32> -> vector<8x16xf32>
    %c1_133 = arith.constant 1 : index
    %c0_134 = arith.constant 0 : index
    %c0_135 = arith.constant 0 : index
    %204 = vector.load %arg16[%c1_133, %c0_134, %c0_135] : memref<2x32x16xf32, #tpu.memory_space<vmem>>, vector<1x32x16xf32>
    %205 = vector.shape_cast %204 : vector<1x32x16xf32> to vector<32x16xf32>
    %cst_136 = arith.constant dense<0.000000e+00> : vector<8x16xf32>
    %206 = tpu.matmul %168, %205, %cst_136 {dimension_numbers = #tpu.dot_dimension_numbers<[1], [0], [0], [1], [0, 0, 1, 1], [], []>} : vector<8x32xf32>, vector<32x16xf32>, vector<8x16xf32> -> vector<8x16xf32>
    %cst_137 = arith.constant dense<0.000000e+00> : vector<8x8xf32>
    %207 = tpu.matmul %200, %203, %cst_137 {dimension_numbers = #tpu.dot_dimension_numbers<[1], [1], [0], [0], [0, 0, 1, 0], [], []>} : vector<8x16xf32>, vector<8x16xf32>, vector<8x8xf32> -> vector<8x8xf32>
    %cst_138 = arith.constant 2.500000e-01 : f32
    %208 = vector.broadcast %cst_138 : f32 to vector<8x8xf32>
    %209 = arith.mulf %207, %208 : vector<8x8xf32>
    %cst_139 = arith.constant dense<0xFF800000> : vector<8xf32>
    %210 = vector.multi_reduction <maximumf>, %209, %cst_139 [1] : vector<8x8xf32> to vector<8xf32>
    %211 = vector.shape_cast %210 : vector<8xf32> to vector<8x1xf32>
    %212 = vector.broadcast %211 : vector<8x1xf32> to vector<8x8xf32>
    %213 = arith.subf %209, %212 : vector<8x8xf32>
    %214 = math.exp %213 : vector<8x8xf32>
    %cst_140 = arith.constant dense<0.000000e+00> : vector<8xf32>
    %215 = vector.multi_reduction <add>, %214, %cst_140 [1] : vector<8x8xf32> to vector<8xf32>
    %216 = vector.shape_cast %215 : vector<8xf32> to vector<8x1xf32>
    %217 = vector.broadcast %216 : vector<8x1xf32> to vector<8x8xf32>
    %218 = arith.divf %214, %217 : vector<8x8xf32>
    %219 = arith.addf %192, %218 : vector<8x8xf32>
    %cst_141 = arith.constant dense<0.000000e+00> : vector<8x16xf32>
    %220 = tpu.matmul %218, %206, %cst_141 {dimension_numbers = #tpu.dot_dimension_numbers<[1], [0], [0], [1], [0, 0, 1, 1], [], []>} : vector<8x8xf32>, vector<8x16xf32>, vector<8x16xf32> -> vector<8x16xf32>
    %c1_142 = arith.constant 1 : index
    %c0_143 = arith.constant 0 : index
    %c0_144 = arith.constant 0 : index
    %221 = vector.load %arg17[%c1_142, %c0_143, %c0_144] : memref<2x16x32xf32, #tpu.memory_space<vmem>>, vector<1x16x32xf32>
    %222 = vector.shape_cast %221 : vector<1x16x32xf32> to vector<16x32xf32>
    %cst_145 = arith.constant dense<0.000000e+00> : vector<8x32xf32>
    %223 = tpu.matmul %220, %222, %cst_145 {dimension_numbers = #tpu.dot_dimension_numbers<[1], [0], [0], [1], [0, 0, 1, 1], [], []>} : vector<8x16xf32>, vector<16x32xf32>, vector<8x32xf32> -> vector<8x32xf32>
    %224 = arith.addf %197, %223 : vector<8x32xf32>
    %c8_146 = arith.constant 8 : index
    %c0_147 = arith.constant 0 : index
    %225 = vector.load %arg34[%c8_146, %c0_147] : memref<16x32xf32, #tpu.memory_space<vmem>>, vector<8x32xf32>
    tpu.vector_store %arg34[%c8_146, %c0_147], %224 {strides = array<i32>} : memref<16x32xf32, #tpu.memory_space<vmem>>, vector<8x32xf32>,
    %cst_148 = arith.constant 5.000000e-01 : f32
    %226 = vector.broadcast %cst_148 : f32 to vector<8x8xf32>
    %227 = arith.mulf %219, %226 : vector<8x8xf32>
    %c8_149 = arith.constant 8 : index
    %c0_150 = arith.constant 0 : index
    %228 = vector.load %arg35[%c8_149, %c0_150] : memref<16x8xf32, #tpu.memory_space<vmem>>, vector<8x8xf32>
    tpu.vector_store %arg35[%c8_149, %c0_150], %227 {strides = array<i32>} : memref<16x8xf32, #tpu.memory_space<vmem>>, vector<8x8xf32>,
    %c0_151 = arith.constant 0 : index
    %c0_152 = arith.constant 0 : index
    %229 = vector.load %arg34[%c0_151, %c0_152] : memref<16x32xf32, #tpu.memory_space<vmem>>, vector<16x32xf32>
    %c0_153 = arith.constant 0 : index
    %c0_154 = arith.constant 0 : index
    %230 = vector.load %arg18[%c0_153, %c0_154] : memref<1x32xf32, #tpu.memory_space<vmem>>, vector<1x32xf32>
    %c0_155 = arith.constant 0 : index
    %c0_156 = arith.constant 0 : index
    %231 = vector.load %arg19[%c0_155, %c0_156] : memref<1x32xf32, #tpu.memory_space<vmem>>, vector<1x32xf32>
    %cst_157 = arith.constant dense<0.000000e+00> : vector<16xf32>
    %232 = vector.multi_reduction <add>, %229, %cst_157 [1] : vector<16x32xf32> to vector<16xf32>
    %233 = vector.shape_cast %232 : vector<16xf32> to vector<16x1xf32>
    %cst_158 = arith.constant 3.200000e+01 : f32
    %234 = vector.broadcast %cst_158 : f32 to vector<16x1xf32>
    %235 = arith.divf %233, %234 : vector<16x1xf32>
    %236 = vector.broadcast %235 : vector<16x1xf32> to vector<16x32xf32>
    %237 = arith.subf %229, %236 : vector<16x32xf32>
    %238 = arith.mulf %237, %237 : vector<16x32xf32>
    %cst_159 = arith.constant dense<0.000000e+00> : vector<16xf32>
    %239 = vector.multi_reduction <add>, %238, %cst_159 [1] : vector<16x32xf32> to vector<16xf32>
    %240 = vector.shape_cast %239 : vector<16xf32> to vector<16x1xf32>
    %cst_160 = arith.constant 3.200000e+01 : f32
    %241 = vector.broadcast %cst_160 : f32 to vector<16x1xf32>
    %242 = arith.divf %240, %241 : vector<16x1xf32>
    %243 = vector.broadcast %235 : vector<16x1xf32> to vector<16x32xf32>
    %244 = arith.subf %229, %243 : vector<16x32xf32>
    %cst_161 = arith.constant 9.99999974E-6 : f32
    %245 = vector.broadcast %cst_161 : f32 to vector<16x1xf32>
    %246 = arith.addf %242, %245 : vector<16x1xf32>
    %247 = math.rsqrt %246 : vector<16x1xf32>
    %248 = vector.broadcast %247 : vector<16x1xf32> to vector<16x32xf32>
    %249 = arith.mulf %244, %248 : vector<16x32xf32>
    %250 = vector.broadcast %230 : vector<1x32xf32> to vector<16x32xf32>
    %251 = arith.mulf %249, %250 : vector<16x32xf32>
    %252 = vector.broadcast %231 : vector<1x32xf32> to vector<16x32xf32>
    %253 = arith.addf %251, %252 : vector<16x32xf32>
    %c0_162 = arith.constant 0 : index
    %c0_163 = arith.constant 0 : index
    %254 = vector.load %arg20[%c0_162, %c0_163] : memref<32x32xf32, #tpu.memory_space<vmem>>, vector<32x32xf32>
    %cst_164 = arith.constant dense<0.000000e+00> : vector<16x32xf32>
    %255 = tpu.matmul %253, %254, %cst_164 {dimension_numbers = #tpu.dot_dimension_numbers<[1], [0], [0], [1], [0, 0, 1, 1], [], []>} : vector<16x32xf32>, vector<32x32xf32>, vector<16x32xf32> -> vector<16x32xf32>
    %c0_165 = arith.constant 0 : index
    %c0_166 = arith.constant 0 : index
    %256 = vector.load %arg21[%c0_165, %c0_166] : memref<1x32xf32, #tpu.memory_space<vmem>>, vector<1x32xf32>
    %257 = vector.broadcast %256 : vector<1x32xf32> to vector<16x32xf32>
    %258 = arith.addf %255, %257 : vector<16x32xf32>
    %cst_167 = arith.constant 0.000000e+00 : f32
    %259 = vector.broadcast %cst_167 : f32 to vector<16x32xf32>
    %260 = arith.maximumf %258, %259 : vector<16x32xf32>
    %c0_168 = arith.constant 0 : index
    %c0_169 = arith.constant 0 : index
    %261 = vector.load %arg22[%c0_168, %c0_169] : memref<32x32xf32, #tpu.memory_space<vmem>>, vector<32x32xf32>
    %cst_170 = arith.constant dense<0.000000e+00> : vector<16x32xf32>
    %262 = tpu.matmul %260, %261, %cst_170 {dimension_numbers = #tpu.dot_dimension_numbers<[1], [0], [0], [1], [0, 0, 1, 1], [], []>} : vector<16x32xf32>, vector<32x32xf32>, vector<16x32xf32> -> vector<16x32xf32>
    %c0_171 = arith.constant 0 : index
    %c0_172 = arith.constant 0 : index
    %263 = vector.load %arg23[%c0_171, %c0_172] : memref<1x32xf32, #tpu.memory_space<vmem>>, vector<1x32xf32>
    %264 = vector.broadcast %263 : vector<1x32xf32> to vector<16x32xf32>
    %265 = arith.addf %262, %264 : vector<16x32xf32>
    %266 = arith.addf %265, %229 : vector<16x32xf32>
    %c0_173 = arith.constant 0 : index
    %c0_174 = arith.constant 0 : index
    %267 = vector.load %arg35[%c0_173, %c0_174] : memref<16x8xf32, #tpu.memory_space<vmem>>, vector<16x8xf32>
    %c0_175 = arith.constant 0 : index
    %c0_176 = arith.constant 0 : index
    %268 = vector.load %arg24[%c0_175, %c0_176] : memref<32x4xf32, #tpu.memory_space<vmem>>, vector<32x4xf32>
    %cst_177 = arith.constant dense<0.000000e+00> : vector<16x4xf32>
    %269 = tpu.matmul %266, %268, %cst_177 {dimension_numbers = #tpu.dot_dimension_numbers<[1], [0], [0], [1], [0, 0, 1, 1], [], []>} : vector<16x32xf32>, vector<32x4xf32>, vector<16x4xf32> -> vector<16x4xf32>
    %c0_178 = arith.constant 0 : index
    %c0_179 = arith.constant 0 : index
    %270 = vector.load %arg25[%c0_178, %c0_179] : memref<1x4xf32, #tpu.memory_space<vmem>>, vector<1x4xf32>
    %271 = vector.broadcast %270 : vector<1x4xf32> to vector<16x4xf32>
    %272 = arith.addf %269, %271 : vector<16x4xf32>
    %cst_180 = arith.constant 0.000000e+00 : f32
    %273 = vector.broadcast %cst_180 : f32 to vector<16x4xf32>
    %274 = arith.maximumf %272, %273 : vector<16x4xf32>
    %c0_181 = arith.constant 0 : index
    %c0_182 = arith.constant 0 : index
    %275 = vector.load %arg26[%c0_181, %c0_182] : memref<4x4xf32, #tpu.memory_space<vmem>>, vector<4x4xf32>
    %cst_183 = arith.constant dense<0.000000e+00> : vector<16x4xf32>
    %276 = tpu.matmul %274, %275, %cst_183 {dimension_numbers = #tpu.dot_dimension_numbers<[1], [0], [0], [1], [0, 0, 1, 1], [], []>} : vector<16x4xf32>, vector<4x4xf32>, vector<16x4xf32> -> vector<16x4xf32>
    %c0_184 = arith.constant 0 : index
    %c0_185 = arith.constant 0 : index
    %277 = vector.load %arg27[%c0_184, %c0_185] : memref<1x4xf32, #tpu.memory_space<vmem>>, vector<1x4xf32>
    %278 = vector.broadcast %277 : vector<1x4xf32> to vector<16x4xf32>
    %279 = arith.addf %276, %278 : vector<16x4xf32>
    %c0_186 = arith.constant 0 : index
    %c0_187 = arith.constant 0 : index
    %280 = vector.load %arg28[%c0_186, %c0_187] : memref<4x4xf32, #tpu.memory_space<vmem>>, vector<4x4xf32>
    %cst_188 = arith.constant dense<0.000000e+00> : vector<16x4xf32>
    %281 = tpu.matmul %1, %280, %cst_188 {dimension_numbers = #tpu.dot_dimension_numbers<[1], [0], [0], [1], [0, 0, 1, 1], [], []>} : vector<16x4xf32>, vector<4x4xf32>, vector<16x4xf32> -> vector<16x4xf32>
    %c0_189 = arith.constant 0 : index
    %c0_190 = arith.constant 0 : index
    %282 = vector.load %arg29[%c0_189, %c0_190] : memref<8x4xf32, #tpu.memory_space<vmem>>, vector<8x4xf32>
    %cst_191 = arith.constant dense<0.000000e+00> : vector<16x4xf32>
    %283 = tpu.matmul %267, %282, %cst_191 {dimension_numbers = #tpu.dot_dimension_numbers<[1], [0], [0], [1], [0, 0, 1, 1], [], []>} : vector<16x8xf32>, vector<8x4xf32>, vector<16x4xf32> -> vector<16x4xf32>
    %284 = arith.addf %281, %283 : vector<16x4xf32>
    %c0_192 = arith.constant 0 : index
    %c0_193 = arith.constant 0 : index
    %285 = vector.load %arg30[%c0_192, %c0_193] : memref<1x4xf32, #tpu.memory_space<vmem>>, vector<1x4xf32>
    %286 = vector.broadcast %285 : vector<1x4xf32> to vector<16x4xf32>
    %287 = arith.addf %284, %286 : vector<16x4xf32>
    %288 = arith.negf %287 : vector<16x4xf32>
    %289 = math.exp %288 : vector<16x4xf32>
    %cst_194 = arith.constant 1.000000e+00 : f32
    %290 = vector.broadcast %cst_194 : f32 to vector<16x4xf32>
    %291 = arith.addf %290, %289 : vector<16x4xf32>
    %292 = arith.divf %290, %291 : vector<16x4xf32>
    %cst_195 = arith.constant 1.000000e+00 : f32
    %293 = vector.broadcast %cst_195 : f32 to vector<16x4xf32>
    %294 = arith.subf %293, %292 : vector<16x4xf32>
    %295 = arith.mulf %294, %279 : vector<16x4xf32>
    %296 = arith.mulf %292, %61 : vector<16x4xf32>
    %297 = arith.addf %295, %296 : vector<16x4xf32>
    %298 = arith.mulf %1, %0 : vector<16x4xf32>
    %cst_196 = arith.constant 1.000000e+00 : f32
    %299 = vector.broadcast %cst_196 : f32 to vector<16x4xf32>
    %300 = arith.subf %299, %1 : vector<16x4xf32>
    %301 = arith.mulf %300, %297 : vector<16x4xf32>
    %302 = arith.addf %298, %301 : vector<16x4xf32>
    %c0_197 = arith.constant 0 : index
    %c0_198 = arith.constant 0 : index
    %303 = vector.load %arg31[%c0_197, %c0_198] : memref<16x4xf32, #tpu.memory_space<vmem>>, vector<16x4xf32>
    tpu.vector_store %arg31[%c0_197, %c0_198], %302 {strides = array<i32>} : memref<16x4xf32, #tpu.memory_space<vmem>>, vector<16x4xf32>,
    %c0_199 = arith.constant 0 : index
    %c0_200 = arith.constant 0 : index
    %304 = vector.load %arg2[%c0_199, %c0_200] : memref<16x4xf32, #tpu.memory_space<vmem>>, vector<16x4xf32>
    %c0_201 = arith.constant 0 : index
    %c0_202 = arith.constant 0 : index
    %305 = vector.load %arg3[%c0_201, %c0_202] : memref<16x4xf32, #tpu.memory_space<vmem>>, vector<16x4xf32>
    %306 = arith.subf %61, %0 : vector<16x4xf32>
    %307 = math.absf %306 : vector<16x4xf32>
    %308 = arith.mulf %307, %1 : vector<16x4xf32>
    %309 = vector.shape_cast %308 : vector<16x4xf32> to vector<1x16x4xf32>
    %cst_203 = arith.constant dense<0.000000e+00> : vector<1xf32>
    %310 = vector.multi_reduction <add>, %309, %cst_203 [1, 2] : vector<1x16x4xf32> to vector<1xf32>
    %311 = vector.shape_cast %310 : vector<1xf32> to vector<1x1x1xf32>
    %312 = vector.extract %311[0, 0, 0] : f32 from vector<1x1x1xf32>
    %c0_204 = arith.constant 0 : index
    %313 = memref.load %arg32[%c0_204] : memref<6xf32, #tpu.memory_space<smem>>
    memref.store %312, %arg32[%c0_204] : memref<6xf32, #tpu.memory_space<smem>>
    %314 = arith.subf %279, %0 : vector<16x4xf32>
    %315 = math.absf %314 : vector<16x4xf32>
    %316 = arith.mulf %315, %1 : vector<16x4xf32>
    %317 = vector.shape_cast %316 : vector<16x4xf32> to vector<1x16x4xf32>
    %cst_205 = arith.constant dense<0.000000e+00> : vector<1xf32>
    %318 = vector.multi_reduction <add>, %317, %cst_205 [1, 2] : vector<1x16x4xf32> to vector<1xf32>
    %319 = vector.shape_cast %318 : vector<1xf32> to vector<1x1x1xf32>
    %320 = vector.extract %319[0, 0, 0] : f32 from vector<1x1x1xf32>
    %c1_206 = arith.constant 1 : index
    %321 = memref.load %arg32[%c1_206] : memref<6xf32, #tpu.memory_space<smem>>
    memref.store %320, %arg32[%c1_206] : memref<6xf32, #tpu.memory_space<smem>>
    %322 = arith.subf %297, %0 : vector<16x4xf32>
    %323 = math.absf %322 : vector<16x4xf32>
    %324 = arith.mulf %323, %1 : vector<16x4xf32>
    %325 = vector.shape_cast %324 : vector<16x4xf32> to vector<1x16x4xf32>
    %cst_207 = arith.constant dense<0.000000e+00> : vector<1xf32>
    %326 = vector.multi_reduction <add>, %325, %cst_207 [1, 2] : vector<1x16x4xf32> to vector<1xf32>
    %327 = vector.shape_cast %326 : vector<1xf32> to vector<1x1x1xf32>
    %328 = vector.extract %327[0, 0, 0] : f32 from vector<1x1x1xf32>
    %c2 = arith.constant 2 : index
    %329 = memref.load %arg32[%c2] : memref<6xf32, #tpu.memory_space<smem>>
    memref.store %328, %arg32[%c2] : memref<6xf32, #tpu.memory_space<smem>>
    %330 = arith.subf %297, %304 : vector<16x4xf32>
    %331 = math.absf %330 : vector<16x4xf32>
    %332 = arith.mulf %331, %305 : vector<16x4xf32>
    %333 = vector.shape_cast %332 : vector<16x4xf32> to vector<1x16x4xf32>
    %cst_208 = arith.constant dense<0.000000e+00> : vector<1xf32>
    %334 = vector.multi_reduction <add>, %333, %cst_208 [1, 2] : vector<1x16x4xf32> to vector<1xf32>
    %335 = vector.shape_cast %334 : vector<1xf32> to vector<1x1x1xf32>
    %336 = vector.extract %335[0, 0, 0] : f32 from vector<1x1x1xf32>
    %c3 = arith.constant 3 : index
    %337 = memref.load %arg32[%c3] : memref<6xf32, #tpu.memory_space<smem>>
    memref.store %336, %arg32[%c3] : memref<6xf32, #tpu.memory_space<smem>>
    %338 = vector.shape_cast %1 : vector<16x4xf32> to vector<1x16x4xf32>
    %cst_209 = arith.constant dense<0.000000e+00> : vector<1xf32>
    %339 = vector.multi_reduction <add>, %338, %cst_209 [1, 2] : vector<1x16x4xf32> to vector<1xf32>
    %340 = vector.shape_cast %339 : vector<1xf32> to vector<1x1x1xf32>
    %341 = vector.extract %340[0, 0, 0] : f32 from vector<1x1x1xf32>
    %c4 = arith.constant 4 : index
    %342 = memref.load %arg32[%c4] : memref<6xf32, #tpu.memory_space<smem>>
    memref.store %341, %arg32[%c4] : memref<6xf32, #tpu.memory_space<smem>>
    %343 = vector.shape_cast %305 : vector<16x4xf32> to vector<1x16x4xf32>
    %cst_210 = arith.constant dense<0.000000e+00> : vector<1xf32>
    %344 = vector.multi_reduction <add>, %343, %cst_210 [1, 2] : vector<1x16x4xf32> to vector<1xf32>
    %345 = vector.shape_cast %344 : vector<1xf32> to vector<1x1x1xf32>
    %346 = vector.extract %345[0, 0, 0] : f32 from vector<1x1x1xf32>
    %c5 = arith.constant 5 : index
    %347 = memref.load %arg32[%c5] : memref<6xf32, #tpu.memory_space<smem>>
    memref.store %346, %arg32[%c5] : memref<6xf32, #tpu.memory_space<smem>>
    return
  }
}

</mosaic_0001>

<bundles_post_ra>
// kernel: forward.1
= control target key start
LH: loop header
LB: loop body
LE: loop exit
PB: predicated region body
PF: predicated region fallthrough
CT: control target
= control target key end

     0   :  { %s4026_s6 = smov 1   ;;  %s4027_s10 = smov 2   ;;  %s4654_s0 = inlined_call_operand.smem [shape: u32[33], index: -1, kind: input, shape index: {}] }
   0x1   :  { %s4071_s5 = sld [smem:[%s4654_s0]]   ;;  %s4028_s14 = smov 3  }
   0x2   :  { %s4076_s9 = sld [smem:[%s4654_s0 + %s4026_s6]]   ;;  %s4029_s18 = smov 4  }
   0x3   :  { %s4081_s13 = sld [smem:[%s4654_s0 + %s4027_s10]]   ;;  %s4030_s22 = smov 5  }
   0x4   :  { %s4086_s17 = sld [smem:[%s4654_s0 + %s4028_s14]]   ;;  %s4031_s26 = smov 6  }
   0x5   :  { %s4091_s21 = sld [smem:[%s4654_s0 + %s4029_s18]]   ;;  %s4032_s30 = smov 7  }
   0x6   :  { %s4096_s25 = sld [smem:[%s4654_s0 + %s4030_s22]]   ;;  %s4033_s4 = smov 8  }
   0x7   :  { %s4101_s29 = sld [smem:[%s4654_s0 + %s4031_s26]]   ;;  %s4034_s10 = smov 9  }
   0x8   :  { %s4106_s3 = sld [smem:[%s4654_s0 + %s4032_s30]]   ;;  %s4035_s15 = smov 10  }
   0x9   :  { %4661 = sst [smem:[#allocation8_spill]] %s4081_s13  ;;  %s4036_s20 = smov 11  }
   0xa   :  { %4662 = sst [smem:[#allocation9_spill]] %s4086_s17  ;;  %s4037_s26 = smov 12  }
   0xb   :  { %s4111_s8 = sld [smem:[%s4654_s0 + %s4033_s4]]   ;;  %s4038_s1 = smov 13  }
   0xc   :  { %s4116_s14 = sld [smem:[%s4654_s0 + %s4034_s10]]   ;;  %s4039_s7 = smov 14  }
   0xd   :  { %s4121_s19 = sld [smem:[%s4654_s0 + %s4035_s15]]   ;;  %s4040_s15 = smov 15  }
   0xe   :  { %s4126_s24 = sld [smem:[%s4654_s0 + %s4036_s20]]   ;;  %s4041_s22 = smov 16  }
   0xf   :  { %s4131_s30 = sld [smem:[%s4654_s0 + %s4037_s26]]   ;;  %s4042_s28 = smov 17  }
  0x10   :  { %s4136_s6 = sld [smem:[%s4654_s0 + %s4038_s1]]  }
  0x11   :  { %s4141_s12 = sld [smem:[%s4654_s0 + %s4039_s7]]   ;;  %s4043_s7 = smov 18  }
  0x12   :  { %s4146_s20 = sld [smem:[%s4654_s0 + %s4040_s15]]   ;;  %s4044_s15 = smov 19  }
  0x13   :  { %s4151_s27 = sld [smem:[%s4654_s0 + %s4041_s22]]   ;;  %s4045_s22 = smov 20  }
  0x14   :  { %s4156_s4 = sld [smem:[%s4654_s0 + %s4042_s28]]   ;;  %s4046_s28 = smov 21  }
  0x15   :  { %s4161_s17 = sld [smem:[%s4654_s0 + %s4043_s7]]   ;;  %s4047_s7 = smov 22  }
  0x16   :  { %4663 = sst [smem:[#allocation10_spill]] %s4136_s6 }
  0x17   :  { %s4166_s13 = sld [smem:[%s4654_s0 + %s4044_s15]]   ;;  %s4048_s15 = smov 23  }
  0x18   :  { %s4171_s6 = sld [smem:[%s4654_s0 + %s4045_s22]]   ;;  %s4049_s22 = smov 24  }
  0x1a   :  { %4664 = sst [smem:[#allocation11_spill]] %s4156_s4 }
  0x1b   :  { %4665 = sst [smem:[#allocation12_spill]] %s4161_s17 }
  0x1c   :  { %s4176_s4 = sld [smem:[%s4654_s0 + %s4046_s28]]   ;;  %s4050_s28 = smov 25  }
  0x1d   :  { %4666 = sst [smem:[#allocation13_spill]] %s4166_s13 }
  0x1e   :  { %4667 = sst [smem:[#allocation14_spill]] %s4171_s6 }
  0x1f   :  { %s4181_s17 = sld [smem:[%s4654_s0 + %s4047_s7]]   ;;  %s4051_s7 = smov 26  }
  0x20   :  { %s4186_s13 = sld [smem:[%s4654_s0 + %s4048_s15]]   ;;  %s4052_s15 = smov 27  }
  0x21   :  { %s4191_s6 = sld [smem:[%s4654_s0 + %s4049_s22]]   ;;  %s4053_s22 = smov 28  }
  0x22   :  { %4668 = sst [smem:[#allocation15_spill]] %s4176_s4 }
  0x23   :  { %s4196_s4 = sld [smem:[%s4654_s0 + %s4050_s28]]   ;;  %s4054_s28 = smov 29  }
  0x25   :  { %4669 = sst [smem:[#allocation16_spill]] %s4181_s17 }
  0x26   :  { %4670 = sst [smem:[#allocation17_spill]] %s4186_s13 }
  0x27   :  { %4671 = sst [smem:[#allocation18_spill]] %s4191_s6 }
  0x28   :  { %s4201_s17 = sld [smem:[%s4654_s0 + %s4051_s7]]   ;;  %s4055_s7 = smov 30  }
  0x29   :  { %4672 = sst [smem:[#allocation19_spill]] %s4196_s4 }
  0x2a   :  { %s4206_s13 = sld [smem:[%s4654_s0 + %s4052_s15]]   ;;  %s4056_s15 = smov 31  }
  0x2b   :  { %s4211_s6 = sld [smem:[%s4654_s0 + %s4053_s22]]   ;;  %s4057_s22 = smov 32  }
  0x2c   :  { %s4216_s4 = sld [smem:[%s4654_s0 + %s4054_s28]]  }
  0x2e   :  { %4673 = sst [smem:[#allocation20_spill]] %s4201_s17 }
  0x2f   :  { %s4221_s17 = sld [smem:[%s4654_s0 + %s4055_s7]]  }
  0x30   :  { %4674 = sst [smem:[#allocation21_spill]] %s4206_s13 }
  0x31   :  { %4675 = sst [smem:[#allocation22_spill]] %s4211_s6 }
  0x32   :  { %s4226_s13 = sld [smem:[%s4654_s0 + %s4056_s15]]  }
  0x33   :  { %s4231_s6 = sld [smem:[%s4654_s0 + %s4057_s22]]  }
  0x34   :  { %v4234_v0 = vld [vmem:[%s4071_s5] sm:$0xff]  ;;  %vm145_vm0 = vcmask 64512   ;;  %v4058_v2 = vmov 0.0   ;;  %vm4059_vm1 = vmmov 0   ;;  %v4241_v3 = vld [vmem:[%s4071_s5 + $0x8] sm:$0xff] }
  0x35   :  { %v138_v1 = vld [vmem:[%s4091_s21] sm:$0xff]  ;;  %3527 = vmatprep.subr.mxu1 %v4058_v2  ;;  %3529 = vmatprep.mubr.msk.f32.mxu1 %vm4059_vm1, %v4058_v2 }
  0x36   :  { %71 = vsyncpa [#allocation6], 0  ;;  %3528 = vmatpush3.msra.mxu1 %v4234_v0  ;;  %v4060_v4 = vmov 0   ;;  %v139_v5 = vld [vmem:[%s4096_s25] sm:$0xff]  ;;  %vm328_vm2 = vcmask 1043456   ;;  %vm229_vm3 = vcmask 31744  }
  0x37   :  { %3967 = vset.pattern.permute.xlu0 %v4060_v4  ;;  %3530 = vmatmul.mubr.msk.f32.vlgmr.msra.gmra.mrb[0].mxu1 %vm145_vm0, %v138_v1  ;;  %v314_v6 = vld [vmem:[%s4101_s29] sm:$0xf]  ;;  %v4271_v38 = vld [vmem:[%s4076_s9 + $0x8] sm:$0xff]  ;;  %vm616_vm4 = vcmask 261120   ;;  %s4676_s0 = sld [smem:[#allocation10_spill]]  ;;  %vm892_vm5 = vcmask 130048  }
  0x38   :  { %3532 = vmatprep.subr.mxu1 %v4058_v2  ;;  %3534 = vmatprep.mubr.msk.f32.mxu1 %vm4059_vm1, %v4058_v2  ;;  %v436_v36 = vld [vmem:[%s4116_s14] sm:$0xf]  ;;  %v430_v62 = vsub.f32 1.0, %v4271_v38  ;;  %s4677_s21 = sld [smem:[#allocation11_spill]]  ;;  %s4678_s25 = sld [smem:[#allocation12_spill]] }
  0x39   :  { %3533 = vmatpush3.msra.mxu1 %v4241_v3  ;;  %142 = vperm.xlu0 %3967, %v139_v5   ;;  %v4265_v37 = vld [vmem:[%s4076_s9] sm:$0xff]  ;;  %s4679_s29 = sld [smem:[#allocation13_spill]]  ;;  %s4681_s14 = sld [smem:[#allocation16_spill]] }
  0x3a   :  { %3537 = vmatprep.subr.msk.mxu0 %vm328_vm2, %v314_v6  ;;  %3542 = vmatprep.subr.msk.mxu1 %vm328_vm2, %v436_v36  ;;  %v435_v39 = vld [vmem:[%s4111_s8] sm:$0xf]  ;;  %s4680_s8 = sld [smem:[#allocation14_spill]]  ;;  %s4689_s28 = sld [smem:[#allocation8_spill]] }
  0x3b   :  { %3535 = vmatmul.mubr.msk.f32.vlgmr.msra.gmra.mrb[2].mxu1 %vm145_vm0, %v138_v1  ;;  %3538 = vmatpush3.msk.msra.mxu0 %vm328_vm2, %v314_v6  ;;  %v3307_v40 = vld [vmem:[%s4106_s3] ss:$0 sm:$0xff]  ;;  %v429_v1 = vsub.f32 1.0, %v4265_v37  ;;  %v4287_v6 = vmul.f32 %v4265_v37, %v4234_v0 }
  0x3c   :  { %3543 = vmatpush3.msk.msra.mxu1 %vm328_vm2, %v436_v36  ;;  %3544 = vmatprep.mubr.msk.f32.mxu1 %vm229_vm3, %v4265_v37 }
  0x3d   :  { %3547 = vmatprep.subr.msk.mxu1 %vm328_vm2, %v435_v39 }
  0x3f   :  { %3545 = vmatmul.mubr.msk.f32.vlgmr.msra.gmra.mrb[4].mxu1 %vm229_vm3, %v4271_v38 }
  0x40   :  { %3548 = vmatpush3.msk.msra.mxu1 %vm328_vm2, %v435_v39  ;;  %v746_v39 = vld [vmem:[%s4146_s20 + $0x10] sm:$0xff] }
  0xb8   :  { %v143_v7 = vpop.permute.xlu0 %142 }
 0x10a   :  { %v215_v8 = vpop.f32.mrb[0].mxu1 }
 0x10b   :  { %v216_v9 = vadd.f32 %v215_v8, %v143_v7  ;;  %v3531_v10 = vpop.f32.mrb[1].mxu1 }
 0x10d   :  { %v219_v11 = vmul.f32 %v216_v9, %v216_v9 }
 0x10e   :  { %v297_v12 = vpop.f32.mrb[2].mxu1 }
 0x10f   :  { %v220_v13 = vmul.f32 %v219_v11, %v216_v9  ;;  %v298_v14 = vadd.f32 %v297_v12, %v143_v7  ;;  %v3536_v15 = vpop.f32.mrb[3].mxu1  ;;  %v4291_v7 = vmul.f32 %v4271_v38, %v4241_v3  ;;  %v3317_v12 = vld [vmem:[%s4121_s19] ss:$0 sm:$0xff]  ;;  %s4682_s19 = sld [smem:[#allocation18_spill]] }
 0x111   :  { %v221_v16 = vmul.f32 0.044715, %v220_v13  ;;  %v301_v17 = vmul.f32 %v298_v14, %v298_v14 }
 0x113   :  { %v222_v18 = vadd.f32 %v221_v16, %v216_v9  ;;  %v302_v19 = vmul.f32 %v301_v17, %v298_v14 }
 0x115   :  { %v223_v20 = vmul.f32 0.7978846, %v222_v18  ;;  %v303_v21 = vmul.f32 0.044715, %v302_v19 }
 0x117   :  { %3968 = vtanh.f32 %v223_v20  ;;  %v304_v22 = vadd.f32 %v303_v21, %v298_v14 }
 0x119   :  { %v305_v23 = vmul.f32 0.7978846, %v304_v22 }
 0x11b   :  { %3970 = vtanh.f32 %v305_v23 }
 0x121   :  { %v3969_v24 = vpop.eup %3968 }
 0x122   :  { %v225_v25 = vadd.f32 1.0, %v3969_v24 }
 0x124   :  { %v226_v26 = vmul.f32 0.5, %v225_v25 }
 0x125   :  { %v3971_v27 = vpop.eup %3970 }
 0x126   :  { %v227_v28 = vmul.f32 %v226_v26, %v216_v9  ;;  %v307_v29 = vadd.f32 1.0, %v3971_v27  ;;  %v667_v27 = vld [vmem:[%s4141_s12] sm:$0xff] }
 0x128   :  { %v228_v30 = vadd.f32 %v227_v28, %v4234_v0  ;;  %v308_v31 = vmul.f32 0.5, %v307_v29  ;;  %v668_v28 = vld [vmem:[%s4141_s12 + $0x8] sm:$0xff] }
 0x129   :  { %v4317_v29 = vpack.c.bf16 %v668_v28, %v667_v27  ;;  %v3329_v27 = vld [vmem:[%s4141_s12 + $0x30] sm:$0xff]  ;;  %v3330_v28 = vld [vmem:[%s4141_s12 + $0x38] sm:$0xff] }
 0x12a   :  { %230 = vst.msk [vmem:[#allocation2] sm:$0xff] %vm229_vm3, %v228_v30  ;;  %v309_v32 = vmul.f32 %v308_v31, %v298_v14  ;;  %v614_v14 = vld [vmem:[%s4126_s24] sm:$0xff]  ;;  %v745_v31 = vld [vmem:[%s4146_s20 + $0x8] sm:$0xff]  ;;  %s4683_s24 = sld [smem:[#allocation15_spill]] }
 0x12b   :  { %v744_v30 = vld [vmem:[%s4146_s20] sm:$0xff] }
 0x12c   :  { %v310_v33 = vadd.f32 %v309_v32, %v4241_v3  ;;  %v4061_v32 = vmov 0.0|0.0  }
 0x12d   :  { %3800 = vmatprep.subr.bf16.mxu0 %v4061_v32  ;;  %3806 = vmatprep.subr.bf16.mxu1 %v4061_v32 }
 0x12e   :  { %311 = vst.msk [vmem:[#allocation2 + $0x8] sm:$0xff] %vm229_vm3, %v310_v33  ;;  %v4323_v33 = vpack.c.bf16 %v745_v31, %v744_v30  ;;  %v4400_v30 = vpack.c.bf16 %v3330_v28, %v3329_v27  ;;  %v3337_v31 = vld [vmem:[%s4151_s27 + $0x20] sm:$0xff] }
 0x131   :  { %v312_v34 = vld [vmem:[#allocation2] sm:$0xff] }
 0x132   :  { %3539 = vmatprep.mubr.msk.f32.mxu0 %vm229_vm3, %v312_v34 }
 0x135   :  { %v313_v35 = vld [vmem:[#allocation2 + $0x8] sm:$0xff] }
 0x136   :  { %3540 = vmatmul.mubr.msk.f32.vlgmr.msra.gmra.mrb[0].mxu0 %vm229_vm3, %v313_v35 }
 0x137   :  { %3560 = vmatprep.mubr.msk.f32.mxu0 %vm4059_vm1, %v4058_v2  ;;  %3802 = vmatpush3.bf16.msra.mxu0 %v4317_v29 }
 0x138   :  { %3803 = vmatprep.subr.bf16.mxu0 %v4061_v32 }
 0x209   :  { %v3541_v41 = vpop.f32.mrb[0].mxu0 }
 0x20a   :  { %v404_v42 = vadd.f32 %v3541_v41, %v3307_v40  ;;  %v398_v43 = vpop.f32.mrb[1].mxu0 }
 0x20b   :  { %v399_v44 = vadd.f32 %v3307_v40, %v398_v43  ;;  %v747_v40 = vld [vmem:[%s4146_s20 + $0x18] sm:$0xff] }
 0x20c   :  { %v408_v45 = vmul.f32 %v404_v42, %v404_v42  ;;  %v4335_v41 = vpack.c.bf16 %v747_v40, %v746_v39  ;;  %v3339_v39 = vld [vmem:[%s4151_s27 + $0x30] sm:$0xff]  ;;  %v3340_v40 = vld [vmem:[%s4151_s27 + $0x38] sm:$0xff] }
 0x20d   :  { %v407_v46 = vmul.f32 %v399_v44, %v399_v44 }
 0x20e   :  { %v410_v47 = vmul.f32 %v408_v45, %v404_v42 }
 0x20f   :  { %v409_v48 = vmul.f32 %v407_v46, %v399_v44  ;;  %v4342_v46 = vld [vmem:[%s4131_s30] ss:$0 sm:$0xff]  ;;  %s4684_s30 = sld [smem:[#allocation17_spill]] }
 0x210   :  { %v412_v49 = vmul.f32 0.044715, %v410_v47 }
 0x211   :  { %v411_v50 = vmul.f32 0.044715, %v409_v48  ;;  %v818_v48 = vld [vmem:[%s4151_s27] sm:$0xff] }
 0x212   :  { %v414_v51 = vadd.f32 %v412_v49, %v404_v42  ;;  %v819_v49 = vld [vmem:[%s4151_s27 + $0x8] sm:$0xff] }
 0x213   :  { %v413_v52 = vadd.f32 %v411_v50, %v399_v44  ;;  %v4347_v50 = vld [vmem:[%s4676_s0] ss:$0 sm:$0xff] }
 0x214   :  { %v416_v53 = vmul.f32 0.7978846, %v414_v51 }
 0x215   :  { %v415_v54 = vmul.f32 0.7978846, %v413_v52  ;;  %v4350_v52 = vpack.c.bf16 %v819_v49, %v818_v48  ;;  %v3335_v48 = vld [vmem:[%s4146_s20 + $0x38] sm:$0xff] }
 0x216   :  { %3972 = vtanh.f32 %v416_v53 }
 0x217   :  { %3974 = vtanh.f32 %v415_v54  ;;  %v820_v54 = vld [vmem:[%s4151_s27 + $0x10] sm:$0xff] }
 0x220   :  { %v3973_v55 = vpop.eup %3972 }
 0x221   :  { %v3975_v56 = vpop.eup %3974  ;;  %v420_v57 = vadd.f32 1.0, %v3973_v55  ;;  %v821_v55 = vld [vmem:[%s4151_s27 + $0x18] sm:$0xff] }
 0x222   :  { %v419_v58 = vadd.f32 1.0, %v3975_v56  ;;  %v4362_v56 = vpack.c.bf16 %v821_v55, %v820_v54 }
 0x223   :  { %v422_v59 = vmul.f32 0.5, %v420_v57 }
 0x224   :  { %v421_v60 = vmul.f32 0.5, %v419_v58 }
 0x225   :  { %v424_v61 = vmul.f32 %v422_v59, %v404_v42 }
 0x226   :  { %v423_v63 = vmul.f32 %v421_v60, %v399_v44 }
 0x227   :  { %v4281_v4 = vadd.f32 %v424_v61, %v313_v35  ;;  %v670_v35 = vld [vmem:[%s4141_s12 + $0x18] sm:$0xff] }
 0x228   :  { %v4283_v5 = vadd.f32 %v423_v63, %v312_v34  ;;  %v669_v34 = vld [vmem:[%s4141_s12 + $0x10] sm:$0xff] }
 0x229   :  { %v432_v8 = vmul.f32 %v430_v62, %v4281_v4  ;;  %v4330_v36 = vpack.c.bf16 %v670_v35, %v669_v34  ;;  %v3338_v34 = vld [vmem:[%s4151_s27 + $0x28] sm:$0xff]  ;;  %s4687_s27 = sld [smem:[#allocation19_spill]] }
 0x22a   :  { %v431_v9 = vmul.f32 %v429_v1, %v4283_v5  ;;  %v4408_v35 = vpack.c.bf16 %v3338_v34, %v3337_v31  ;;  %v3345_v31 = vld [vmem:[%s4677_s21 + $0x10] sm:$0xff]  ;;  %v3346_v34 = vld [vmem:[%s4677_s21 + $0x18] sm:$0xff] }
 0x22b   :  { %v434_v11 = vadd.f32 %v432_v8, %v4291_v7  ;;  %3805 = vmatpush3.bf16.msra.mxu0 %v4330_v36 }
 0x22c   :  { %v433_v10 = vadd.f32 %v431_v9, %v4287_v6  ;;  %3812 = vmatprep.subr.bf16.mxu0 %v4061_v32 }
 0x22e   :  { %3549 = vmatprep.mubr.msk.f32.mxu1 %vm229_vm3, %v433_v10 }
 0x22f   :  { %3550 = vmatmul.mubr.msk.f32.vlgmr.msra.gmra.mrb[4].mxu1 %vm229_vm3, %v434_v11 }
 0x230   :  { %3571 = vmatprep.mubr.msk.f32.mxu1 %vm4059_vm1, %v4058_v2  ;;  %3808 = vmatpush3.bf16.msra.mxu1 %v4323_v33 }
 0x231   :  { %3809 = vmatprep.subr.bf16.mxu1 %v4061_v32 }
 0x234   :  { %3811 = vmatpush3.bf16.msra.mxu1 %v4335_v41 }
 0x235   :  { %3585 = vmatprep.subr.mxu1 %v4058_v2 }
 0x302   :  { %v3551_v13 = vpop.f32.mrb[4].mxu1 }
 0x303   :  { %v613_v15 = vadd.f32 %v3551_v13, %v3317_v12  ;;  %v596_v16 = vpop.f32.mrb[5].mxu1 }
 0x304   :  { %v612_v17 = vadd.f32 %v3317_v12, %v596_v16 }
 0x305   :  { %v618_v18 = vadd.f32 %v614_v14, %v613_v15 }
 0x306   :  { %v615_v19 = vadd.f32 %v614_v14, %v612_v17  ;;  %v1055_v17 = vld [vmem:[%s4677_s21] sm:$0xff] }
 0x307   :  { %619 = vst.msk [vmem:[#allocation3 + $0x8] sm:$0xff] %vm616_vm4, %v618_v18  ;;  %v1056_v18 = vld [vmem:[%s4677_s21 + $0x8] sm:$0xff] }
 0x308   :  { %617 = vst.msk [vmem:[#allocation3] sm:$0xff] %vm616_vm4, %v615_v19  ;;  %v4385_v19 = vpack.c.bf16 %v1056_v18, %v1055_v17 }
 0x30f   :  { %v4309_v20 = vld [vmem:[#allocation3] sm:$0xff] }
 0x310   :  { %v624_v21 = vsel %vm616_vm4, %v4309_v20, 0.0 }
 0x311   :  { %625 = vadd.xlane.f32.xlu0 %v624_v21 }
 0x39e   :  { %v626_v22 = vpop.xlane.xlu0 %625 }
 0x39f   :  { %v631_v23 = vmul.f32 0.03125, %v626_v22  ;;  %v3327_v22 = vld [vmem:[%s4141_s12 + $0x20] sm:$0xff] }
 0x3a1   :  { %v633_v24 = vsub.f32 %v4309_v20, %v631_v23  ;;  %v3328_v23 = vld [vmem:[%s4141_s12 + $0x28] sm:$0xff]  ;;  %s4685_s12 = sld [smem:[#allocation22_spill]] }
 0x3a3   :  { %v635_v25 = vmul.f32 %v633_v24, %v633_v24 }
 0x3a5   :  { %v637_v26 = vsel %vm616_vm4, %v635_v25, 0.0  ;;  %v4391_v25 = vpack.c.bf16 %v3328_v23, %v3327_v22 }
 0x3a6   :  { %638 = vadd.xlane.f32.xlu1 %v637_v26 }
 0x433   :  { %v639_v42 = vpop.xlane.xlu1 %638 }
 0x434   :  { %v643_v43 = vmul.f32 0.03125, %v639_v42  ;;  %v4416_v42 = vpack.c.bf16 %v3340_v40, %v3339_v39  ;;  %v4471_v39 = vpack.c.bf16 %v3346_v34, %v3345_v31 }
 0x436   :  { %v645_v44 = vadd.f32 1e-05, %v643_v43  ;;  %v3332_v43 = vld [vmem:[%s4146_s20 + $0x20] sm:$0xff] }
 0x438   :  { %3976 = vrsqrt.f32 %v645_v44  ;;  %v3333_v44 = vld [vmem:[%s4146_s20 + $0x28] sm:$0xff] }
 0x442   :  { %v3977_v45 = vpop.eup %3976 }
 0x443   :  { %v649_v47 = vmul.f32 %v3977_v45, %v633_v24  ;;  %v4433_v45 = vpack.c.bf16 %v3333_v44, %v3332_v43 }
 0x445   :  { %v657_v51 = vmul.f32 %v4342_v46, %v649_v47  ;;  %v3334_v47 = vld [vmem:[%s4146_s20 + $0x30] sm:$0xff]  ;;  %s4686_s20 = sld [smem:[#allocation20_spill]] }
 0x447   :  { %v4353_v53 = vadd.f32 %v4347_v50, %v657_v51 }
 0x449   :  { %3561 = vmatmul.mubr.msk.f32.vlgmr.msra.gmra.mrb[2].mxu0 %vm616_vm4, %v4353_v53  ;;  %3572 = vmatmul.mubr.msk.f32.vlgmr.msra.gmra.mrb[6].mxu1 %vm616_vm4, %v4353_v53 }
 0x44a   :  { %3814 = vmatpush3.bf16.msra.mxu0 %v4350_v52  ;;  %3582 = vmatprep.mubr.msk.f32.mxu0 %vm4059_vm1, %v4058_v2 }
 0x44b   :  { %3815 = vmatprep.subr.bf16.mxu0 %v4061_v32  ;;  %3587 = vmatprep.mubr.msk.f32.mxu1 %vm4059_vm1, %v4058_v2 }
 0x44e   :  { %3817 = vmatpush3.bf16.msra.mxu0 %v4362_v56 }
 0x44f   :  { %3590 = vmatprep.subr.mxu0 %v4058_v2 }
 0x451   :  { %3583 = vmatmul.mubr.msk.f32.vlgmr.msra.gmra.mrb[4].mxu0 %vm616_vm4, %v4353_v53 }
 0x452   :  { %3592 = vmatprep.mubr.msk.f32.mxu0 %vm4059_vm1, %v4058_v2 }
 0x51c   :  { %v740_v57 = vpop.f32.mrb[2].mxu0  ;;  %v814_v58 = vpop.f32.mrb[6].mxu1 }
 0x51d   :  { %v3562_v59 = vpop.f32.mrb[3].mxu0  ;;  %v3573_v60 = vpop.f32.mrb[7].mxu1  ;;  %3586 = vmatpush3.xpose.msk.msra.mxu1 %vm892_vm5, %v814_v58 }
 0x51e   :  { %3818 = vmatprep.subr.bf16.mxu1 %v4061_v32 }
 0x520   :  { %3588 = vmatmul.mubr.msk.f32.vlgmr.msra.gmra.mrb[8].mxu1 %vm892_vm5, %v740_v57 }
 0x521   :  { %3599 = vmatprep.mubr.msk.f32.mxu1 %vm4059_vm1, %v4058_v2  ;;  %3820 = vmatpush3.bf16.msra.mxu1 %v4385_v19 }
 0x522   :  { %3827 = vmatprep.subr.bf16.mxu1 %v4061_v32 }
 0x524   :  { %v888_v61 = vpop.f32.mrb[4].mxu0 }
 0x525   :  { %v3584_v63 = vpop.f32.mrb[5].mxu0  ;;  %3591 = vmatpush3.msra.mxu0 %v888_v61 }
 0x526   :  { %3821 = vmatprep.subr.bf16.mxu0 %v4061_v32 }
 0x5f3   :  { %v965_v8 = vpop.f32.mrb[8].mxu1 }
 0x5f4   :  { %v969_v9 = vmul.f32 0.25, %v965_v8  ;;  %v3589_v10 = vpop.f32.mrb[9].mxu1 }
 0x5f6   :  { %v970_v11 = vsel %vm145_vm0, %v969_v9, -inf }
 0x5f7   :  { %971 = vmax.xlane.f32.xlu1 %v970_v11 }
 0x684   :  { %v972_v12 = vpop.xlane.xlu1 %971 }
 0x685   :  { %v973_v13 = vsub.f32 %v969_v9, %v972_v12 }
 0x687   :  { %v974_v14 = vmul.f32 1.442695, %v973_v13  ;;  %v4458_v13 = vld [vmem:[#allocation3 + $0x8] sm:$0xff] }
 0x689   :  { %3978 = vpow2.f32 %v974_v14  ;;  %v627_v14 = vsel %vm616_vm4, %v4458_v13, 0.0 }
 0x693   :  { %v3979_v15 = vpop.eup %3978 }
 0x694   :  { %v976_v16 = vsel %vm145_vm0, %v3979_v15, 0.0 }
 0x695   :  { %977 = vadd.xlane.f32.xlu1 %v976_v16 }
 0x722   :  { %v978_v21 = vpop.xlane.xlu1 %977 }
 0x723   :  { %3980 = vrcp.f32 %v978_v21 }
 0x72d   :  { %v3981_v24 = vpop.eup %3980 }
 0x72e   :  { %v4393_v26 = vmul.f32 %v3981_v24, %v3979_v15 }
 0x730   :  { %3593 = vmatmul.mubr.msk.f32.vlgmr.msra.gmra.mrb[6].mxu0 %vm145_vm0, %v4393_v26 }
 0x731   :  { %3823 = vmatpush3.bf16.msra.mxu0 %v4391_v25  ;;  %3610 = vmatprep.mubr.msk.f32.mxu0 %vm4059_vm1, %v4058_v2 }
 0x732   :  { %3824 = vmatprep.subr.bf16.mxu0 %v4061_v32 }
 0x735   :  { %3826 = vmatpush3.bf16.msra.mxu0 %v4400_v30 }
 0x736   :  { %3833 = vmatprep.subr.bf16.mxu0 %v4061_v32 }
 0x738   :  { %3611 = vmatmul.mubr.msk.f32.vlgmr.msra.gmra.mrb[8].mxu0 %vm616_vm4, %v4353_v53 }
 0x739   :  { %3835 = vmatpush3.bf16.msra.mxu0 %v4408_v35  ;;  %3632 = vmatprep.mubr.msk.f32.mxu0 %vm4059_vm1, %v4058_v2 }
 0x73a   :  { %3836 = vmatprep.subr.bf16.mxu0 %v4061_v32 }
 0x73d   :  { %3838 = vmatpush3.bf16.msra.mxu0 %v4416_v42 }
 0x73e   :  { %3842 = vmatprep.subr.bf16.mxu0 %v4061_v32 }
 0x740   :  { %3633 = vmatmul.mubr.msk.f32.vlgmr.msra.gmra.mrb[10].mxu0 %vm616_vm4, %v4353_v53 }
 0x741   :  { %3844 = vmatpush3.bf16.msra.mxu0 %v4317_v29  ;;  %3660 = vmatprep.mubr.msk.f32.mxu0 %vm4059_vm1, %v4058_v2  ;;  %v4439_v29 = vpack.c.bf16 %v3335_v48, %v3334_v47 }
 0x742   :  { %3845 = vmatprep.subr.bf16.mxu0 %v4061_v32 }
 0x745   :  { %3847 = vmatpush3.bf16.msra.mxu0 %v4330_v36 }
 0x746   :  { %3854 = vmatprep.subr.bf16.mxu0 %v4061_v32 }
 0x803   :  { %v1051_v49 = vpop.f32.mrb[6].mxu0 }
 0x804   :  { %v3594_v51 = vpop.f32.mrb[7].mxu0  ;;  %3600 = vmatmul.mubr.msk.f32.vlgmr.msra.gmra.mrb[10].mxu1 %vm892_vm5, %v1051_v49 }
 0x805   :  { %3829 = vmatpush3.bf16.msra.mxu1 %v4433_v45  ;;  %3621 = vmatprep.mubr.msk.f32.mxu1 %vm4059_vm1, %v4058_v2 }
 0x806   :  { %3830 = vmatprep.subr.bf16.mxu1 %v4061_v32 }
 0x809   :  { %3832 = vmatpush3.bf16.msra.mxu1 %v4439_v29 }
 0x80a   :  { %3635 = vmatprep.subr.mxu1 %v4058_v2 }
 0x80b   :  { %v1202_v36 = vpop.f32.mrb[8].mxu0 }
 0x80c   :  { %v3612_v54 = vpop.f32.mrb[9].mxu0  ;;  %3622 = vmatmul.mubr.msk.f32.vlgmr.msra.gmra.mrb[12].mxu1 %vm616_vm4, %v4353_v53 }
 0x80d   :  { %3637 = vmatprep.mubr.msk.f32.mxu1 %vm4059_vm1, %v4058_v2 }
 0x813   :  { %v1352_v55 = vpop.f32.mrb[10].mxu0 }
 0x814   :  { %v3634_v57 = vpop.f32.mrb[11].mxu0 }
 0x8df   :  { %v1277_v58 = vpop.f32.mrb[12].mxu1 }
 0x8e0   :  { %v3623_v59 = vpop.f32.mrb[13].mxu1  ;;  %3636 = vmatpush3.xpose.msk.msra.mxu1 %vm892_vm5, %v1277_v58 }
 0x8e1   :  { %3640 = vmatprep.subr.mxu1 %v4058_v2 }
 0x8e3   :  { %3638 = vmatmul.mubr.msk.f32.vlgmr.msra.gmra.mrb[14].mxu1 %vm892_vm5, %v1202_v36 }
 0x8e4   :  { %3641 = vmatpush3.msra.mxu1 %v1352_v55  ;;  %3642 = vmatprep.mubr.msk.f32.mxu1 %vm4059_vm1, %v4058_v2 }
 0x8e5   :  { %3839 = vmatprep.subr.bf16.mxu1 %v4061_v32 }
 0x9b6   :  { %v1428_v53 = vpop.f32.mrb[14].mxu1 }
 0x9b7   :  { %v1432_v60 = vmul.f32 0.25, %v1428_v53  ;;  %v3639_v61 = vpop.f32.mrb[15].mxu1 }
 0x9b9   :  { %v1433_v63 = vsel %vm145_vm0, %v1432_v60, -inf }
 0x9ba   :  { %1434 = vmax.xlane.f32.xlu1 %v1433_v63 }
 0xa47   :  { %v1435_v8 = vpop.xlane.xlu1 %1434 }
 0xa48   :  { %v1436_v9 = vsub.f32 %v1432_v60, %v1435_v8 }
 0xa4a   :  { %v1437_v10 = vmul.f32 1.442695, %v1436_v9 }
 0xa4c   :  { %3982 = vpow2.f32 %v1437_v10 }
 0xa56   :  { %v3983_v11 = vpop.eup %3982 }
 0xa57   :  { %v1439_v12 = vsel %vm145_vm0, %v3983_v11, 0.0 }
 0xa58   :  { %1440 = vadd.xlane.f32.xlu1 %v1439_v12 }
 0xa5c   :  { %628 = vadd.xlane.f32.xlu1 %v627_v14 }
 0xae5   :  { %v1441_v15 = vpop.xlane.xlu1 %1440 }
 0xae6   :  { %3984 = vrcp.f32 %v1441_v15 }
 0xae9   :  { %v629_v16 = vpop.xlane.xlu1 %628 }
 0xaea   :  { %v632_v17 = vmul.f32 0.03125, %v629_v16 }
 0xaec   :  { %v634_v18 = vsub.f32 %v4458_v13, %v632_v17 }
 0xaee   :  { %v636_v21 = vmul.f32 %v634_v18, %v634_v18 }
 0xaf0   :  { %v3985_v22 = vpop.eup %3984  ;;  %v640_v23 = vsel %vm616_vm4, %v636_v21, 0.0 }
 0xaf1   :  { %v1443_v24 = vmul.f32 %v3985_v22, %v3983_v11  ;;  %641 = vadd.xlane.f32.xlu1 %v640_v23  ;;  %v3146_v23 = vsub.f32 %v4283_v5, %v4234_v0 }
 0xaf3   :  { %v1444_v27 = vadd.f32 %v1443_v24, %v4393_v26  ;;  %3643 = vmatmul.mubr.msk.f32.vlgmr.msra.gmra.mrb[16].mxu1 %vm145_vm0, %v1443_v24  ;;  %v3147_v24 = vsub.f32 %v4281_v4, %v4241_v3  ;;  %v3148_v31 = vand.u32 2147483647, %v3146_v23  ;;  %v2572_v23 = vld [vmem:[%s4680_s8 + $0x10] sm:$0xff] }
 0xaf4   :  { %3649 = vmatprep.mubr.msk.f32.mxu1 %vm4059_vm1, %v4058_v2  ;;  %3841 = vmatpush3.bf16.msra.mxu1 %v4471_v39 }
 0xaf5   :  { %v1596_v28 = vmul.f32 0.5, %v1444_v27  ;;  %3848 = vmatprep.subr.bf16.mxu1 %v4061_v32  ;;  %v3149_v34 = vand.u32 2147483647, %v3147_v24  ;;  %v2573_v24 = vld [vmem:[%s4680_s8 + $0x18] sm:$0xff] }
 0xaf7   :  { %1597 = vst.msk [vmem:[#allocation4] sm:$0xff] %vm145_vm0, %v1596_v28 }
 0xb7e   :  { %v642_v40 = vpop.xlane.xlu1 %641 }
 0xb7f   :  { %v644_v43 = vmul.f32 0.03125, %v642_v40 }
 0xb81   :  { %v646_v44 = vadd.f32 1e-05, %v644_v43 }
 0xb83   :  { %3986 = vrsqrt.f32 %v646_v44 }
 0xb8d   :  { %v3987_v26 = vpop.eup %3986 }
 0xb8e   :  { %v650_v47 = vmul.f32 %v3987_v26, %v634_v18  ;;  %v3150_v26 = vmul.f32 %v3148_v31, %v4265_v37 }
 0xb90   :  { %v658_v48 = vmul.f32 %v4342_v46, %v650_v47  ;;  %v3151_v47 = vmul.f32 %v3149_v34, %v4271_v38 }
 0xb92   :  { %v4477_v49 = vadd.f32 %v4347_v50, %v658_v48  ;;  %v3153_v3 = vsel %vm229_vm3, %v3151_v47, 0.0 }
 0xb94   :  { %3661 = vmatmul.mubr.msk.f32.vlgmr.msra.gmra.mrb[12].mxu0 %vm616_vm4, %v4477_v49 }
 0xb95   :  { %3856 = vmatpush3.bf16.msra.mxu0 %v4350_v52  ;;  %3682 = vmatprep.mubr.msk.f32.mxu0 %vm4059_vm1, %v4058_v2 }
 0xb96   :  { %3857 = vmatprep.subr.bf16.mxu0 %v4061_v32 }
 0xb99   :  { %3859 = vmatpush3.bf16.msra.mxu0 %v4362_v56 }
 0xb9a   :  { %3690 = vmatprep.subr.mxu0 %v4058_v2 }
 0xb9c   :  { %3683 = vmatmul.mubr.msk.f32.vlgmr.msra.gmra.mrb[14].mxu0 %vm616_vm4, %v4477_v49 }
 0xb9d   :  { %3692 = vmatprep.mubr.msk.f32.mxu0 %vm4059_vm1, %v4058_v2 }
 0xbc6   :  { %v1514_v46 = vpop.f32.mrb[16].mxu1 }
 0xbc7   :  { %v3644_v50 = vpop.f32.mrb[17].mxu1  ;;  %3650 = vmatmul.mubr.msk.f32.vlgmr.msra.gmra.mrb[10].mxu1 %vm892_vm5, %v1514_v46 }
 0xbc8   :  { %3850 = vmatpush3.bf16.msra.mxu1 %v4323_v33  ;;  %3671 = vmatprep.mubr.msk.f32.mxu1 %vm4059_vm1, %v4058_v2 }
 0xbc9   :  { %3851 = vmatprep.subr.bf16.mxu1 %v4061_v32 }
 0xbcc   :  { %3853 = vmatpush3.bf16.msra.mxu1 %v4335_v41 }
 0xbcd   :  { %3685 = vmatprep.subr.mxu1 %v4058_v2 }
 0xbcf   :  { %3672 = vmatmul.mubr.msk.f32.vlgmr.msra.gmra.mrb[18].mxu1 %vm616_vm4, %v4477_v49 }
 0xbd0   :  { %3687 = vmatprep.mubr.msk.f32.mxu1 %vm4059_vm1, %v4058_v2 }
 0xc67   :  { %v1671_v52 = vpop.f32.mrb[12].mxu0 }
 0xc68   :  { %v3662_v56 = vpop.f32.mrb[13].mxu0 }
 0xc6f   :  { %v1819_v51 = vpop.f32.mrb[14].mxu0 }
 0xc70   :  { %v3684_v36 = vpop.f32.mrb[15].mxu0  ;;  %3691 = vmatpush3.msra.mxu0 %v1819_v51 }
 0xc71   :  { %3863 = vmatprep.subr.bf16.mxu0 %v4061_v32 }
 0xc9a   :  { %v1590_v33 = vpop.f32.mrb[10].mxu1 }
 0xc9b   :  { %v3908_v54 = vadd.f32 %v1590_v33, %v4309_v20  ;;  %v3651_v55 = vpop.f32.mrb[11].mxu1 }
 0xc9d   :  { %1595 = vst.msk [vmem:[#allocation3] sm:$0xff] %vm616_vm4, %v3908_v54 }
 0xca2   :  { %v1745_v41 = vpop.f32.mrb[18].mxu1 }
 0xca3   :  { %v3673_v57 = vpop.f32.mrb[19].mxu1  ;;  %3686 = vmatpush3.xpose.msk.msra.mxu1 %vm892_vm5, %v1745_v41 }
 0xca4   :  { %3860 = vmatprep.subr.bf16.mxu1 %v4061_v32  ;;  %v4551_v21 = vld [vmem:[#allocation3] sm:$0xff] }
 0xca5   :  { %v2528_v22 = vsel %vm616_vm4, %v4551_v21, 0.0 }
 0xca6   :  { %3688 = vmatmul.mubr.msk.f32.vlgmr.msra.gmra.mrb[20].mxu1 %vm892_vm5, %v1671_v52 }
 0xca7   :  { %3862 = vmatpush3.bf16.msra.mxu1 %v4385_v19  ;;  %3699 = vmatprep.mubr.msk.f32.mxu1 %vm4059_vm1, %v4058_v2 }
 0xca8   :  { %3869 = vmatprep.subr.bf16.mxu1 %v4061_v32 }
 0xd79   :  { %v1895_v58 = vpop.f32.mrb[20].mxu1 }
 0xd7a   :  { %v1899_v20 = vmul.f32 0.25, %v1895_v58  ;;  %v3689_v59 = vpop.f32.mrb[21].mxu1 }
 0xd7c   :  { %v1900_v53 = vsel %vm145_vm0, %v1899_v20, -inf }
 0xd7d   :  { %1901 = vmax.xlane.f32.xlu1 %v1900_v53 }
 0xe0a   :  { %v1902_v60 = vpop.xlane.xlu1 %1901 }
 0xe0b   :  { %v1903_v61 = vsub.f32 %v1899_v20, %v1902_v60  ;;  %v3376_v60 = vld [vmem:[%s4678_s25] ss:$0 sm:$0xff] }
 0xe0d   :  { %v1904_v63 = vmul.f32 1.442695, %v1903_v61 }
 0xe0f   :  { %3988 = vpow2.f32 %v1904_v63 }
 0xe19   :  { %v3989_v8 = vpop.eup %3988 }
 0xe1a   :  { %v1906_v9 = vsel %vm145_vm0, %v3989_v8, 0.0 }
 0xe1b   :  { %1907 = vadd.xlane.f32.xlu1 %v1906_v9  ;;  %v3377_v9 = vld [vmem:[%s4679_s29] ss:$0 sm:$0xff] }
 0xea8   :  { %v1908_v19 = vpop.xlane.xlu1 %1907 }
 0xea9   :  { %3990 = vrcp.f32 %v1908_v19 }
 0xeb3   :  { %v3991_v10 = vpop.eup %3990 }
 0xeb4   :  { %v4514_v11 = vmul.f32 %v3991_v10, %v3989_v8 }
 0xeb6   :  { %3693 = vmatmul.mubr.msk.f32.vlgmr.msra.gmra.mrb[16].mxu0 %vm145_vm0, %v4514_v11 }
 0xeb7   :  { %3865 = vmatpush3.bf16.msra.mxu0 %v4391_v25  ;;  %3710 = vmatprep.mubr.msk.f32.mxu0 %vm4059_vm1, %v4058_v2 }
 0xeb8   :  { %3866 = vmatprep.subr.bf16.mxu0 %v4061_v32 }
 0xebb   :  { %3868 = vmatpush3.bf16.msra.mxu0 %v4400_v30 }
 0xebc   :  { %3875 = vmatprep.subr.bf16.mxu0 %v4061_v32 }
 0xebe   :  { %3711 = vmatmul.mubr.msk.f32.vlgmr.msra.gmra.mrb[18].mxu0 %vm616_vm4, %v4477_v49 }
 0xebf   :  { %3877 = vmatpush3.bf16.msra.mxu0 %v4408_v35  ;;  %3732 = vmatprep.mubr.msk.f32.mxu0 %vm4059_vm1, %v4058_v2 }
 0xec0   :  { %3878 = vmatprep.subr.bf16.mxu0 %v4061_v32 }
 0xec3   :  { %3880 = vmatpush3.bf16.msra.mxu0 %v4416_v42 }
 0xec6   :  { %3733 = vmatmul.mubr.msk.f32.vlgmr.msra.gmra.mrb[20].mxu0 %vm616_vm4, %v4477_v49 }
 0xf89   :  { %v1981_v25 = vpop.f32.mrb[16].mxu0 }
 0xf8a   :  { %v3694_v12 = vpop.f32.mrb[17].mxu0  ;;  %3700 = vmatmul.mubr.msk.f32.vlgmr.msra.gmra.mrb[22].mxu1 %vm892_vm5, %v1981_v25 }
 0xf8b   :  { %3871 = vmatpush3.bf16.msra.mxu1 %v4433_v45  ;;  %3721 = vmatprep.mubr.msk.f32.mxu1 %vm4059_vm1, %v4058_v2 }
 0xf8c   :  { %3872 = vmatprep.subr.bf16.mxu1 %v4061_v32 }
 0xf8f   :  { %3874 = vmatpush3.bf16.msra.mxu1 %v4439_v29 }
 0xf90   :  { %3735 = vmatprep.subr.mxu1 %v4058_v2 }
 0xf91   :  { %v2131_v30 = vpop.f32.mrb[18].mxu0 }
 0xf92   :  { %v3712_v35 = vpop.f32.mrb[19].mxu0  ;;  %3722 = vmatmul.mubr.msk.f32.vlgmr.msra.gmra.mrb[24].mxu1 %vm616_vm4, %v4477_v49  ;;  %v3152_v49 = vsel %vm229_vm3, %v3150_v26, 0.0 }
 0xf93   :  { %3737 = vmatprep.mubr.msk.f32.mxu1 %vm4059_vm1, %v4058_v2  ;;  %v3154_v46 = vadd.f32 %v3153_v3, %v3152_v49  ;;  %v2667_v49 = vld [vmem:[%s4681_s14 + $0x18] sm:$0xff] }
 0xf99   :  { %v2279_v42 = vpop.f32.mrb[20].mxu0 }
 0xf9a   :  { %v3734_v14 = vpop.f32.mrb[21].mxu0 }
0x1065   :  { %v2205_v45 = vpop.f32.mrb[24].mxu1 }
0x1066   :  { %v3723_v15 = vpop.f32.mrb[25].mxu1  ;;  %3736 = vmatpush3.xpose.msk.msra.mxu1 %vm892_vm5, %v2205_v45 }
0x1067   :  { %3740 = vmatprep.subr.mxu1 %v4058_v2 }
0x1069   :  { %3738 = vmatmul.mubr.msk.f32.vlgmr.msra.gmra.mrb[26].mxu1 %vm892_vm5, %v2131_v30 }
0x106a   :  { %3741 = vmatpush3.msra.mxu1 %v2279_v42  ;;  %3742 = vmatprep.mubr.msk.f32.mxu1 %vm4059_vm1, %v4058_v2 }
0x106b   :  { %3881 = vmatprep.subr.bf16.mxu1 %v4061_v32 }
0x113c   :  { %v2355_v29 = vpop.f32.mrb[26].mxu1 }
0x113d   :  { %v2359_v16 = vmul.f32 0.25, %v2355_v29  ;;  %v3739_v17 = vpop.f32.mrb[27].mxu1 }
0x113e   :  { %v2570_v17 = vld [vmem:[%s4680_s8] sm:$0xff] }
0x113f   :  { %v2360_v18 = vsel %vm145_vm0, %v2359_v16, -inf }
0x1140   :  { %2361 = vmax.xlane.f32.xlu0 %v2360_v18  ;;  %v2571_v18 = vld [vmem:[%s4680_s8 + $0x8] sm:$0xff] }
0x1144   :  { %2529 = vadd.xlane.f32.xlu0 %v2528_v22  ;;  %v3884_v22 = vpack.c.bf16 %v2571_v18, %v2570_v17 }
0x1146   :  { %3885 = vmatprep.subr.bf16.mxu0 %v3884_v22 }
0x1147   :  { %3887 = vmatpush3.bf16.msra.mxu0 %v3884_v22 }
0x11cd   :  { %v2362_v27 = vpop.xlane.xlu0 %2361 }
0x11ce   :  { %v2363_v32 = vsub.f32 %v2359_v16, %v2362_v27  ;;  %v3888_v27 = vpack.c.bf16 %v2573_v24, %v2572_v23 }
0x11d0   :  { %v2364_v28 = vmul.f32 1.442695, %v2363_v32  ;;  %3889 = vmatprep.subr.bf16.mxu0 %v3888_v27  ;;  %v2664_v32 = vld [vmem:[%s4681_s14] sm:$0xff] }
0x11d1   :  { %v2530_v40 = vpop.xlane.xlu0 %2529  ;;  %3891 = vmatpush3.bf16.msra.mxu0 %v3888_v27 }
0x11d2   :  { %3992 = vpow2.f32 %v2364_v28  ;;  %v2534_v43 = vmul.f32 0.03125, %v2530_v40  ;;  %v2665_v28 = vld [vmem:[%s4681_s14 + $0x8] sm:$0xff] }
0x11d3   :  { %v3892_v31 = vpack.c.bf16 %v2665_v28, %v2664_v32 }
0x11d4   :  { %v2536_v44 = vsub.f32 %v4551_v21, %v2534_v43 }
0x11d6   :  { %v2538_v48 = vmul.f32 %v2536_v44, %v2536_v44 }
0x11d8   :  { %v2540_v0 = vsel %vm616_vm4, %v2538_v48, 0.0 }
0x11d9   :  { %2541 = vadd.xlane.f32.xlu0 %v2540_v0  ;;  %v2666_v0 = vld [vmem:[%s4681_s14 + $0x10] sm:$0xff] }
0x11da   :  { %v3896_v3 = vpack.c.bf16 %v2667_v49, %v2666_v0  ;;  %v4008_v49 = vld [vmem:[%s4071_s5 + $0x8] sm:$0xff] }
0x11dc   :  { %v3993_v50 = vpop.eup %3992 }
0x11dd   :  { %3155 = vadd.xlane.f32.xlu0 %v3154_v46  ;;  %v2366_v52 = vsel %vm145_vm0, %v3993_v50, 0.0  ;;  %v2760_v46 = vld [vmem:[%s4682_s19] sm:$0xff] }
0x11de   :  { %2367 = vadd.xlane.f32.xlu1 %v2366_v52 }
0x1266   :  { %v2542_v56 = vpop.xlane.xlu0 %2541 }
0x1267   :  { %v2546_v51 = vmul.f32 0.03125, %v2542_v56  ;;  %v3378_v56 = vld [vmem:[%s4683_s24] ss:$0 sm:$0xff] }
0x1269   :  { %v2548_v36 = vadd.f32 1e-05, %v2546_v51 }
0x126a   :  { %v3156_v33 = vpop.xlane.xlu0 %3155 }
0x126b   :  { %3994 = vrsqrt.f32 %v2548_v36  ;;  %v3157_v54 = vrot.slane %v3156_v33, 4  ;;  %v2368_v55 = vpop.xlane.xlu1 %2367 }
0x126c   :  { %3996 = vrcp.f32 %v2368_v55 }
0x126d   :  { %v3158_v41 = vadd.f32 %v3157_v54, %v3156_v33 }
0x126f   :  { %v3159_v57 = vrot.slane %v3158_v41, 2 }
0x1271   :  { %v3160_v58 = vadd.f32 %v3159_v57, %v3158_v41  ;;  %v2762_v57 = vld [vmem:[%s4682_s19 + $0x10] sm:$0xff] }
0x1273   :  { %v3161_v20 = vrot.slane %v3160_v58, 1 }
0x1275   :  { %v3995_v59 = vpop.eup %3994  ;;  %v3162_v53 = vadd.f32 %v3161_v20, %v3160_v58  ;;  %v2763_v58 = vld [vmem:[%s4682_s19 + $0x18] sm:$0xff] }
0x1276   :  { %v3997_v61 = vpop.eup %3996  ;;  %v2552_v63 = vmul.f32 %v3995_v59, %v2536_v44  ;;  %v3904_v20 = vpack.c.bf16 %v2763_v58, %v2762_v57  ;;  %v2947_v59 = vld [vmem:[%s4216_s4] sm:$0xff]  ;;  %s4688_s4 = sld [smem:[#allocation21_spill]] }
0x1277   :  { %v2370_v8 = vmul.f32 %v3997_v61, %v3993_v50  ;;  %3918 = vpush %v3162_v53  ;;  %v2761_v50 = vld [vmem:[%s4682_s19 + $0x8] sm:$0xff]  ;;  %v3381_v53 = vld [vmem:[%s4684_s30] ss:$0 sm:$0xff] }
0x1278   :  { %v2560_v19 = vmul.f32 %v3376_v60, %v2552_v63  ;;  %v3900_v52 = vpack.c.bf16 %v2761_v50, %v2760_v46 }
0x1279   :  { %v2371_v10 = vadd.f32 %v2370_v8, %v4514_v11  ;;  %3743 = vmatmul.mubr.msk.f32.vlgmr.msra.gmra.mrb[28].mxu1 %vm145_vm0, %v2370_v8 }
0x127a   :  { %v2568_v25 = vadd.f32 %v3377_v9, %v2560_v19  ;;  %3883 = vmatpush3.bf16.msra.mxu1 %v4471_v39  ;;  %3749 = vmatprep.mubr.msk.f32.mxu1 %vm4059_vm1, %v4058_v2 }
0x127b   :  { %v2522_v12 = vmul.f32 0.5, %v2371_v10  ;;  %3893 = vmatprep.subr.bf16.mxu1 %v3892_v31  ;;  %3901 = vmatprep.subr.bf16.mxu0 %v3900_v52  ;;  %v2946_v10 = vld [vmem:[%s4685_s12] sm:$0xf] }
0x127c   :  { %3760 = vmatprep.mubr.msk.f32.mxu0 %vm616_vm4, %v2568_v25  ;;  %v2758_v25 = vld [vmem:[#allocation4] sm:$0xff] }
0x127d   :  { %2523 = vst.msk [vmem:[#allocation4 + $0x8] sm:$0xff] %vm145_vm0, %v2522_v12  ;;  %v3387_v28 = vld [vmem:[%s4688_s4] ss:$0 sm:$0xff] }
0x1284   :  { %v2759_v12 = vld [vmem:[#allocation4 + $0x8] sm:$0xff] }
0x12a8   :  { %s3919_s3 = spop %3918 }
0x12a9   :  { %3165 = sst [smem:[#allocation5]] %s3919_s3 }
0x134c   :  { %v2441_v30 = vpop.f32.mrb[28].mxu1 }
0x134d   :  { %v3744_v35 = vpop.f32.mrb[29].mxu1  ;;  %3750 = vmatmul.mubr.msk.f32.vlgmr.msra.gmra.mrb[22].mxu1 %vm892_vm5, %v2441_v30  ;;  %v3384_v30 = vld [vmem:[%s4687_s27] ss:$0 sm:$0xff] }
0x134e   :  { %3895 = vmatpush3.bf16.msra.mxu1 %v3892_v31 }
0x134f   :  { %3897 = vmatprep.subr.bf16.mxu1 %v3896_v3 }
0x1352   :  { %3899 = vmatpush3.bf16.msra.mxu1 %v3896_v3 }
0x1420   :  { %v2516_v11 = vpop.f32.mrb[22].mxu1 }
0x1421   :  { %v3909_v42 = vadd.f32 %v2516_v11, %v4458_v13  ;;  %v3751_v39 = vpop.f32.mrb[23].mxu1 }
0x1423   :  { %2521 = vst.msk [vmem:[#allocation3 + $0x8] sm:$0xff] %vm616_vm4, %v3909_v42 }
0x142a   :  { %v4578_v2 = vld [vmem:[#allocation3 + $0x8] sm:$0xff] }
0x142b   :  { %v2531_v14 = vsel %vm616_vm4, %v4578_v2, 0.0 }
0x142c   :  { %2532 = vadd.xlane.f32.xlu1 %v2531_v14 }
0x14b9   :  { %v2533_v45 = vpop.xlane.xlu1 %2532 }
0x14ba   :  { %v2535_v15 = vmul.f32 0.03125, %v2533_v45 }
0x14bc   :  { %v2537_v29 = vsub.f32 %v4578_v2, %v2535_v15 }
0x14be   :  { %v2539_v16 = vmul.f32 %v2537_v29, %v2537_v29 }
0x14c0   :  { %v2543_v13 = vsel %vm616_vm4, %v2539_v16, 0.0 }
0x14c1   :  { %2544 = vadd.xlane.f32.xlu1 %v2543_v13 }
0x154e   :  { %v2545_v34 = vpop.xlane.xlu1 %2544 }
0x154f   :  { %v2547_v40 = vmul.f32 0.03125, %v2545_v34 }
0x1551   :  { %v2549_v43 = vadd.f32 1e-05, %v2547_v40 }
0x1553   :  { %3998 = vrsqrt.f32 %v2549_v43 }
0x155d   :  { %v3999_v44 = vpop.eup %3998 }
0x155e   :  { %v2553_v26 = vmul.f32 %v3999_v44, %v2537_v29  ;;  %v3396_v29 = vld [vmem:[%s4221_s17] ss:$0 sm:$0xff]  ;;  %s4690_s17 = sld [smem:[#allocation9_spill]] }
0x1560   :  { %v2561_v47 = vmul.f32 %v3376_v60, %v2553_v26 }
0x1562   :  { %v2569_v48 = vadd.f32 %v3377_v9, %v2561_v47 }
0x1564   :  { %3761 = vmatmul.mubr.msk.f32.vlgmr.msra.gmra.mrb[22].mxu0 %vm616_vm4, %v2569_v48 }
0x1565   :  { %3903 = vmatpush3.bf16.msra.mxu0 %v3900_v52  ;;  %v4009_v52 = vld [vmem:[%s4071_s5] sm:$0xff] }
0x1566   :  { %3905 = vmatprep.subr.bf16.mxu0 %v3904_v20 }
0x1569   :  { %3907 = vmatpush3.bf16.msra.mxu0 %v3904_v20 }
0x156a   :  { %3790 = vmatprep.subr.mxu0 %v2947_v59 }
0x1637   :  { %v3762_v51 = vpop.f32.mrb[22].mxu0 }
0x1638   :  { %v2659_v36 = vadd.f32 %v3762_v51, %v3378_v56  ;;  %v2653_v33 = vpop.f32.mrb[23].mxu0  ;;  %v3143_v51 = vld [vmem:[%s4689_s28 + $0x8] sm:$0xff] }
0x1639   :  { %v2654_v54 = vadd.f32 %v3378_v56, %v2653_v33 }
0x163a   :  { %v2663_v41 = vmax.f32 %v2659_v36, 0.0 }
0x163b   :  { %v2662_v55 = vmax.f32 %v2654_v54, 0.0  ;;  %v3142_v54 = vld [vmem:[%s4689_s28] sm:$0xff] }
0x163d   :  { %3771 = vmatprep.mubr.msk.f32.mxu1 %vm616_vm4, %v2662_v55 }
0x163e   :  { %3772 = vmatmul.mubr.msk.f32.vlgmr.msra.gmra.mrb[30].mxu1 %vm616_vm4, %v2663_v41 }
0x1711   :  { %v3773_v60 = vpop.f32.mrb[30].mxu1 }
0x1712   :  { %v2753_v61 = vadd.f32 %v3773_v60, %v3381_v53  ;;  %v2747_v63 = vpop.f32.mrb[31].mxu1 }
0x1713   :  { %v2748_v8 = vadd.f32 %v3381_v53, %v2747_v63  ;;  %v4011_v53 = vld [vmem:[%s4076_s9] sm:$0xff] }
0x1714   :  { %v2757_v19 = vadd.f32 %v2753_v61, %v4578_v2  ;;  %v3145_v61 = vld [vmem:[%s4690_s17 + $0x8] sm:$0xff] }
0x1715   :  { %v2756_v9 = vadd.f32 %v2748_v8, %v4551_v21  ;;  %v2854_v21 = vld [vmem:[%s4686_s20] sm:$0xf] }
0x1716   :  { %3785 = vmatprep.subr.msk.mxu1 %vm328_vm2, %v2854_v21 }
0x1717   :  { %3782 = vmatprep.mubr.msk.f32.mxu0 %vm616_vm4, %v2756_v9  ;;  %3786 = vmatpush3.msk.msra.mxu1 %vm328_vm2, %v2854_v21 }
0x1718   :  { %3783 = vmatmul.mubr.msk.f32.vlgmr.msra.gmra.mrb[24].mxu0 %vm616_vm4, %v2757_v19 }
0x1719   :  { %3792 = vmatprep.mubr.msk.f32.mxu0 %vm145_vm0, %v2758_v25  ;;  %3791 = vmatpush3.msra.mxu0 %v2947_v59 }
0x171a   :  { %3795 = vmatprep.subr.msk.mxu0 %vm328_vm2, %v2946_v10 }
0x171c   :  { %3793 = vmatmul.mubr.msk.f32.vlgmr.msra.gmra.mrb[26].mxu0 %vm145_vm0, %v2759_v12 }
0x171d   :  { %3796 = vmatpush3.msk.msra.mxu0 %vm328_vm2, %v2946_v10  ;;  %3797 = vmatprep.mubr.msk.f32.mxu0 %vm229_vm3, %v4265_v37 }
0x1724   :  { %3798 = vmatmul.mubr.msk.f32.vlgmr.msra.gmra.mrb[26].mxu0 %vm229_vm3, %v4271_v38  ;;  %v3144_v38 = vld [vmem:[%s4690_s17] sm:$0xff] }
0x17eb   :  { %v3784_v35 = vpop.f32.mrb[24].mxu0 }
0x17ec   :  { %v2849_v11 = vadd.f32 %v3784_v35, %v3384_v30  ;;  %v2843_v42 = vpop.f32.mrb[25].mxu0 }
0x17ed   :  { %v2844_v39 = vadd.f32 %v3384_v30, %v2843_v42 }
0x17ee   :  { %v2853_v14 = vmax.f32 %v2849_v11, 0.0 }
0x17ef   :  { %v2852_v2 = vmax.f32 %v2844_v39, 0.0 }
0x17f1   :  { %3787 = vmatprep.mubr.msk.f32.mxu1 %vm229_vm3, %v2852_v2  ;;  %v3241_v2 = vsel %vm229_vm3, %v3145_v61, 0.0 }
0x17f2   :  { %3788 = vmatmul.mubr.msk.f32.vlgmr.msra.gmra.mrb[32].mxu1 %vm229_vm3, %v2853_v14 }
0x17f7   :  { %v3799_v45 = vpop.f32.mrb[26].mxu0 }
0x17f8   :  { %v3098_v15 = vpop.f32.mrb[27].mxu0  ;;  %v3115_v16 = vadd.f32 %v3799_v45, %v3396_v29 }
0x17f9   :  { %v3114_v13 = vadd.f32 %v3396_v29, %v3098_v15  ;;  %v3226_v15 = vsel %vm229_vm3, %v4011_v53, 0.0 }
0x17fa   :  { %v3398_v17 = vmul.f32 -1.442695, %v3115_v16 }
0x17fb   :  { %v3397_v18 = vmul.f32 -1.442695, %v3114_v13 }
0x17fc   :  { %4000 = vpow2.f32 %v3398_v17 }
0x17fd   :  { %4002 = vpow2.f32 %v3397_v18 }
0x1806   :  { %v4001_v22 = vpop.eup %4000 }
0x1807   :  { %v4003_v23 = vpop.eup %4002  ;;  %v3123_v24 = vadd.f32 1.0, %v4001_v22 }
0x1808   :  { %v3122_v27 = vadd.f32 1.0, %v4003_v23 }
0x1809   :  { %4004 = vrcp.f32 %v3123_v24 }
0x180a   :  { %4006 = vrcp.f32 %v3122_v27 }
0x1813   :  { %v4005_v32 = vpop.eup %4004 }
0x1814   :  { %v4007_v31 = vpop.eup %4006  ;;  %v3129_v43 = vsub.f32 1.0, %v4005_v32  ;;  %v3133_v0 = vmul.f32 %v4005_v32, %v4281_v4  ;;  %v4010_v4 = vld [vmem:[%s4076_s9 + $0x8] sm:$0xff] }
0x1815   :  { %v3128_v47 = vsub.f32 1.0, %v4007_v31  ;;  %v3132_v50 = vmul.f32 %v4007_v31, %v4283_v5  ;;  %v3227_v29 = vsel %vm229_vm3, %v4010_v4, 0.0 }
0x1816   :  { %v3228_v18 = vadd.f32 %v3227_v29, %v3226_v15 }
0x18c5   :  { %v3789_v34 = vpop.f32.mrb[32].mxu1 }
0x18c6   :  { %v2943_v40 = vadd.f32 %v3789_v34, %v3387_v28  ;;  %v2937_v44 = vpop.f32.mrb[33].mxu1 }
0x18c7   :  { %v2938_v26 = vadd.f32 %v3387_v28, %v2937_v44 }
0x18c8   :  { %v3131_v48 = vmul.f32 %v3129_v43, %v2943_v40  ;;  %v3167_v3 = vsub.f32 %v2943_v40, %v4008_v49 }
0x18c9   :  { %v3130_v46 = vmul.f32 %v3128_v47, %v2938_v26  ;;  %v3166_v56 = vsub.f32 %v2938_v26, %v4009_v52 }
0x18ca   :  { %v3135_v36 = vadd.f32 %v3133_v0, %v3131_v48  ;;  %v3169_v33 = vand.u32 2147483647, %v3167_v3 }
0x18cb   :  { %v3134_v55 = vadd.f32 %v3132_v50, %v3130_v46  ;;  %v3168_v41 = vand.u32 2147483647, %v3166_v56 }
0x18cc   :  { %v3137_v57 = vmul.f32 %v3135_v36, %v430_v62  ;;  %v3171_v58 = vmul.f32 %v4010_v4, %v3169_v33  ;;  %v3207_v20 = vsub.f32 %v3135_v36, %v3143_v51  ;;  %v3187_v59 = vsub.f32 %v3135_v36, %v4008_v49 }
0x18cd   :  { %v3136_v5 = vmul.f32 %v3134_v55, %v429_v1  ;;  %v3170_v60 = vmul.f32 %v4011_v53, %v3168_v41  ;;  %v3206_v63 = vsub.f32 %v3134_v55, %v3142_v54  ;;  %v3186_v8 = vsub.f32 %v3134_v55, %v4009_v52 }
0x18ce   :  { %v3139_v9 = vadd.f32 %v3137_v57, %v4291_v7  ;;  %v3173_v19 = vsel %vm229_vm3, %v3171_v58, 0.0  ;;  %v3209_v62 = vand.u32 2147483647, %v3207_v20  ;;  %v3189_v10 = vand.u32 2147483647, %v3187_v59 }
0x18cf   :  { %v3138_v25 = vadd.f32 %v3136_v5, %v4287_v6  ;;  %v3172_v12 = vsel %vm229_vm3, %v3170_v60, 0.0  ;;  %v3208_v37 = vand.u32 2147483647, %v3206_v63  ;;  %v3188_v21 = vand.u32 2147483647, %v3186_v8 }
0x18d0   :  { %3141 = vst.msk [vmem:[%s4226_s13 + $0x8] sm:$0xff] %vm229_vm3, %v3139_v9  ;;  %v3174_v1 = vadd.f32 %v3173_v19, %v3172_v12  ;;  %v3211_v30 = vmul.f32 %v3209_v62, %v3145_v61  ;;  %v3191_v35 = vmul.f32 %v4010_v4, %v3189_v10  ;;  %v3240_v6 = vsel %vm229_vm3, %v3144_v38, 0.0 }
0x18d1   :  { %3140 = vst.msk [vmem:[%s4226_s13] sm:$0xff] %vm229_vm3, %v3138_v25  ;;  %v3210_v11 = vmul.f32 %v3208_v37, %v3144_v38  ;;  %v3190_v7 = vmul.f32 %v4011_v53, %v3188_v21  ;;  %v3242_v17 = vadd.f32 %v3241_v2, %v3240_v6  ;;  %s3262_s13 = sshll.u32 %s4231_s6, 4  ;;  %s3263_s13 = int_to_ptr.vmem [resolvable:$true] %s3262_s13 }
0x18d2   :  { %3175 = vadd.xlane.f32.xlu1 %v3174_v1  ;;  %v3213_v42 = vsel %vm229_vm3, %v3211_v30, 0.0  ;;  %v3193_v39 = vsel %vm229_vm3, %v3191_v35, 0.0  ;;  %s4012_s10 = scalar_lea.vmem %s3263_s13, 16  ;;  %p4017_p1 = scmp.lt.s32.totalorder %s3263_s13, %s3263_s13 }
0x18d3   :  { %v3212_v14 = vsel %vm229_vm3, %v3210_v11, 0.0  ;;  %v3192_v45 = vsel %vm229_vm3, %v3190_v7, 0.0  ;;  %p4013_p0 = scmp.ne.s32.totalorder %s3263_s13, %s4012_s10  ;;  %p4018_p2 = scmp.lt.s32.totalorder %s4012_s10, %s4012_s10 }
0x18d4   :  { %v3214_v16 = vadd.f32 %v3213_v42, %v3212_v14  ;;  %v3194_v13 = vadd.f32 %v3193_v39, %v3192_v45 }
0x18d5   :  { %p4019_p3 = por %p4018_p2, %p4017_p1 }
0x18d6   :  { %3215 = vadd.xlane.f32.xlu1 %v3214_v16  ;;  %3195 = vadd.xlane.f32.xlu0 %v3194_v13 }
0x18d7   :  { %p4020_p4 = pnand %p4019_p3, %p4013_p0 }
0x18da   :  { %3243 = vadd.xlane.f32.xlu1 %v3242_v17  ;;  %3229 = vadd.xlane.f32.xlu0 %v3228_v18 }
0x195f   :  { %v3176_v22 = vpop.xlane.xlu1 %3175 }
0x1960   :  { %v3177_v23 = vrot.slane %v3176_v22, 4 }
0x1962   :  { %v3178_v24 = vadd.f32 %v3177_v23, %v3176_v22 }
0x1963   :  { %v3216_v27 = vpop.xlane.xlu1 %3215  ;;  %v3196_v32 = vpop.xlane.xlu0 %3195 }
0x1964   :  { %v3179_v28 = vrot.slane %v3178_v24, 2  ;;  %v3217_v31 = vrot.slane %v3216_v27, 4  ;;  %v3197_v34 = vrot.slane %v3196_v32, 4 }
0x1966   :  { %v3218_v40 = vadd.f32 %v3217_v31, %v3216_v27  ;;  %v3198_v43 = vadd.f32 %v3197_v34, %v3196_v32  ;;  %v3180_v44 = vadd.f32 %v3179_v28, %v3178_v24 }
0x1967   :  { %v3244_v26 = vpop.xlane.xlu1 %3243  ;;  %v3230_v47 = vpop.xlane.xlu0 %3229 }
0x1968   :  { %v3219_v48 = vrot.slane %v3218_v40, 2  ;;  %v3199_v0 = vrot.slane %v3198_v43, 2  ;;  %v3245_v49 = vrot.slane %v3244_v26, 4  ;;  %v3231_v3 = vrot.slane %v3230_v47, 4 }
0x1969   :  { %v3181_v46 = vrot.slane %v3180_v44, 1 }
0x196a   :  { %v3246_v50 = vadd.f32 %v3245_v49, %v3244_v26  ;;  %v3232_v52 = vadd.f32 %v3231_v3, %v3230_v47  ;;  %v3200_v56 = vadd.f32 %v3199_v0, %v3198_v43  ;;  %v3220_v51 = vadd.f32 %v3219_v48, %v3218_v40 }
0x196b   :  { %v3182_v36 = vadd.f32 %v3181_v46, %v3180_v44 }
0x196c   :  { %v3247_v33 = vrot.slane %v3246_v50, 2  ;;  %v3233_v54 = vrot.slane %v3232_v52, 2  ;;  %v3201_v55 = vrot.slane %v3200_v56, 1  ;;  %v3221_v41 = vrot.slane %v3220_v51, 1 }
0x196d   :  { %3920 = vpush %v3182_v36 }
0x196e   :  { %v3248_v57 = vadd.f32 %v3247_v33, %v3246_v50  ;;  %v3234_v4 = vadd.f32 %v3233_v54, %v3232_v52  ;;  %v3202_v58 = vadd.f32 %v3201_v55, %v3200_v56  ;;  %v3222_v20 = vadd.f32 %v3221_v41, %v3220_v51 }
0x1970   :  { %3922 = vpush %v3202_v58  ;;  %v3235_v59 = vrot.slane %v3234_v4, 1  ;;  %v3249_v5 = vrot.slane %v3248_v57, 1 }
0x1971   :  { %3924 = vpush %v3222_v20 }
0x1972   :  { %v3236_v53 = vadd.f32 %v3235_v59, %v3234_v4  ;;  %v3250_v60 = vadd.f32 %v3249_v5, %v3248_v57 }
0x1974   :  { %3926 = vpush %v3236_v53 }
0x1975   :  { %3928 = vpush %v3250_v60 }
0x199e   :  { %s3921_s5 = spop %3920 }
0x199f   :  { %3185 = sst [smem:[#allocation5 + $0x1]] %s3921_s5 }
0x19a1   :  { %s3923_s9 = spop %3922 }
0x19a2   :  { %3205 = sst [smem:[#allocation5 + $0x2]] %s3923_s9  ;;  %s3925_s1 = spop %3924 }
0x19a3   :  { %3225 = sst [smem:[#allocation5 + $0x3]] %s3925_s1 }
0x19a5   :  { %s3927_s2 = spop %3926 }
0x19a6   :  { %3239 = sst [smem:[#allocation5 + $0x4]] %s3927_s2  ;;  %s3929_s7 = spop %3928 }
0x19a7   :  { %3253 = sst [smem:[#allocation5 + $0x5]] %s3929_s7 }
0x19a8   :  { %4023 = shalt.err (!%p4020_p4)
}
0x19a9   :  { %s4062_s11 = smov [#allocation5]  }
0x19aa   :  { %3265 = dma.smem_to_vmem %s4062_s11, 16, %s3263_s13, [#allocation6]  }
0x19ab   :  { %4024 = dma.done.wait [#allocation6], 16  }
0x19ac   :  { %4025 = vsyncadd [#allocation6], 4294967280 }
0x19ad   :  { %3271 = sfence }
0x19ae   :  { %3272 = vsyncpa [#allocation6], 1 }

</bundles_post_ra>
